<compile_context>
chip_gen: v7x
topology: tpu7x:2x2x1
jax: 0.10.0
libtpu: 0.0.40
codegen_flags: <defaults>
</compile_context>

<pallas_src>
import functools

import jax
import jax.numpy as jnp
from jax.experimental import pallas as pl
from jax.experimental.pallas import tpu as pltpu

KSIZE = 3        # TCN default kernel_size when constructed with kwargs
LN_EPS = 1e-8    # LayerNorm eps in ResidualBlock_b
LANE = 128
_HP = jax.lax.Precision.HIGHEST   # pure-JAX reference / one-time weight prepack


def _round_up(n, m):
    return ((n + m - 1) // m) * m


# ----------------------------- kernel helpers -----------------------------
def _ln_relu(y, gamma, beta, inv_c):
    """LayerNorm over the (real) channel dim + ReLU.
    y: [S, Cp] f32 with padded lanes exactly zero; gamma/beta: [1, Cp] (padded 0)."""
    mu = jnp.sum(y, axis=-1, keepdims=True) * inv_c
    msq = jnp.sum(y * y, axis=-1, keepdims=True) * inv_c
    var = jnp.maximum(msq - mu * mu, 0.0)                 # single-pass variance
    scale = jax.lax.rsqrt(var + LN_EPS) * gamma           # gamma folded into scale
    return jnp.maximum((y - mu) * scale + beta, 0.0)


def _causal_conv(x_bf16, w_ref, bias, dilation, row_ids):
    """Causal dilated conv along S as K per-tap bf16 matmuls.  The time shift is
    applied to the OUTPUT via pltpu.roll (XLU) + a causal row mask -- no padded
    input copy, no [S, K*C] concat.
    x_bf16: [S, Cp] bf16; w_ref: [K, Cp, Cp] bf16 ref; bias: [1, Cp] f32."""
    S = x_bf16.shape[0]
    # tap K-1 has zero shift
    acc = jnp.dot(x_bf16, w_ref[KSIZE - 1], preferred_element_type=jnp.float32) + bias
    for j in range(KSIZE - 1):
        shift = (KSIZE - 1 - j) * dilation                 # static
        if shift >= S:                                     # fully outside the window
            continue
        y = jnp.dot(x_bf16, w_ref[j], preferred_element_type=jnp.float32)
        y = pltpu.roll(y, shift=shift, axis=0)             # y[t] <- y[t - shift]
        acc = acc + jnp.where(row_ids >= shift, y, 0.0)    # zero the wrapped rows
    return acc


# --------------------------------- kernel ---------------------------------
def decoder_kernel(x_ref, w1_ref, w2_ref, vec_ref, a_ref, wh_ref, bh_ref, o_ref,
                   *, dilations, inv_c):
    """Whole decoder for one batch element; the residual stream never leaves VMEM."""
    x = x_ref[0]                                           # [S, Cp] f32 residual stream
    S = x.shape[0]
    row_ids = jax.lax.broadcasted_iota(jnp.int32, (S, x.shape[1]), 0)

    for nb, d in enumerate(dilations):                     # static unroll over blocks
        vecs = vec_ref[nb]                                 # [8, Cp] f32 (one slab)
        b1, g1, be1 = vecs[0:1], vecs[1:2], vecs[2:3]
        b2, g2, be2 = vecs[3:4], vecs[4:5], vecs[5:6]
        h = _causal_conv(x.astype(jnp.bfloat16), w1_ref.at[nb], b1, d, row_ids)
        h = _ln_relu(h, g1, be1, inv_c)
        h = _causal_conv(h.astype(jnp.bfloat16), w2_ref.at[nb], b2, 2 * d, row_ids)
        h = _ln_relu(h, g2, be2, inv_c)
        x = a_ref[nb] * h + x                              # residual scale from SMEM

    # fused head:  (x @ wo + bo) @ wp + bp  ==  x @ (wo@wp) + (bo@wp + bp)
    y = jnp.dot(x.astype(jnp.bfloat16), wh_ref[...],
                preferred_element_type=jnp.float32) + bh_ref[...]
    o_ref[0] = y.astype(o_ref.dtype)                       # lane-dense [S, Fp] store


# --------------------------------- wrapper ---------------------------------
def pack_decoder_params(params):
    """One-time repack: lane-pad to 128, stack per-block slabs, fuse the head."""
    blocks = params["blocks"]
    nb = len(blocks)
    C = params["wo"].shape[0]
    F = params["wp"].shape[1]
    Cp = max(LANE, _round_up(C, LANE))
    Fp = max(LANE, _round_up(F, LANE))

    def pad_w(w):      # [K, C, C] -> [K, Cp, Cp] bf16, zero pad
        return jnp.pad(w.astype(jnp.bfloat16), ((0, 0), (0, Cp - C), (0, Cp - C)))

    def pad_v(v):      # [1, C] -> [1, Cp] f32, zero pad (keeps padded lanes at 0)
        return jnp.pad(v.astype(jnp.float32), ((0, 0), (0, Cp - C)))

    W1 = jnp.stack([pad_w(b["w1"]) for b in blocks])       # [NB, K, Cp, Cp] bf16
    W2 = jnp.stack([pad_w(b["w2"]) for b in blocks])

    def vec_slab(b):   # bias / gamma / beta rows packed into one [8, Cp] slab
        rows = [pad_v(b["b1"]), pad_v(b["g1"]), pad_v(b["be1"]),
                pad_v(b["b2"]), pad_v(b["g2"]), pad_v(b["be2"]),
                jnp.zeros((1, Cp), jnp.float32), jnp.zeros((1, Cp), jnp.float32)]
        return jnp.concatenate(rows, axis=0)
    VEC = jnp.stack([vec_slab(b) for b in blocks])         # [NB, 8, Cp] f32

    # algebraic head fusion (exact, f32): W_head = wo @ wp, b_head = bo @ wp + bp
    w_head = jnp.dot(params["wo"], params["wp"], precision=_HP)                 # [C, F]
    b_head = jnp.dot(params["bo"], params["wp"], precision=_HP) + params["bp"]  # [1, F]
    WH = jnp.pad(w_head, ((0, Cp - C), (0, Fp - F))).astype(jnp.bfloat16)       # [Cp, Fp]
    BH = jnp.pad(b_head, ((0, 0), (0, Fp - F))).astype(jnp.float32)             # [1, Fp]

    return dict(
        dilations=tuple(int(d) for d in params["dilations"]),
        C=C, Cp=Cp, F=F, Fp=Fp,
        W1=W1, W2=W2, VEC=VEC,
        A=jnp.stack([b["a"][0, 0] for b in blocks]).astype(jnp.float32),        # [NB]
        WH=WH, BH=BH,
    )


def decoder_forward(x, packed):
    B, S, C = x.shape
    Cp, F, Fp = packed["Cp"], packed["F"], packed["Fp"]
    dil = packed["dilations"]
    nb = len(dil)

    if Cp != C:   # lane-pad the channels once in the wrapper (everything in-kernel is dense)
        x = jnp.pad(x, ((0, 0), (0, 0), (0, Cp - C)))

    kern = functools.partial(decoder_kernel, dilations=dil, inv_c=1.0 / C)

    def const(shape):   # constant-index weight slab (same block every grid step)
        zeros = (0,) * len(shape)
        return pl.BlockSpec(shape, lambda b, z=zeros: z)

    out = pl.pallas_call(
        kern,
        out_shape=jax.ShapeDtypeStruct((B, S, Fp), x.dtype),
        grid=(B,),
        in_specs=[
            pl.BlockSpec((1, S, Cp), lambda b: (b, 0, 0)),       # x (per-batch slab)
            const((nb, KSIZE, Cp, Cp)),                          # W1 (bf16 per-tap)
            const((nb, KSIZE, Cp, Cp)),                          # W2 (bf16 per-tap)
            const((nb, 8, Cp)),                                  # packed bias/LN vectors
            pl.BlockSpec(memory_space=pltpu.MemorySpace.SMEM),   # residual scales a [NB]
            const((Cp, Fp)),                                     # fused head weight (bf16)
            const((1, Fp)),                                      # fused head bias
        ],
        out_specs=pl.BlockSpec((1, S, Fp), lambda b: (b, 0, 0)),
        compiler_params=pltpu.CompilerParams(
            dimension_semantics=("parallel",),      # v7x: the 2 TCs split the batch
            vmem_limit_bytes=48 * 1024 * 1024,      # fits v7x's 64 MiB/TC with headroom
        ),
    )(x, packed["W1"], packed["W2"], packed["VEC"], packed["A"],
      packed["WH"], packed["BH"])
    return out[..., :F]     # strip the lane padding of the head output


# ------------------------------ params init -------------------------------
def init_params(key, hidden_dim, feat_num, block_num, dilations):
    dil = list(dilations) * block_num   # matches `args.dilations * block_num`
    C, F = hidden_dim, feat_num
    blocks = []
    for _ in dil:
        key, k1, k2, kb1, kb2 = jax.random.split(key, 5)
        blocks.append(dict(
            # conv weights stored in bf16 (MXU operands); all accumulation is f32 in-kernel
            w1=(0.1 * jax.random.normal(k1, (KSIZE, C, C), jnp.float32)).astype(jnp.bfloat16),
            b1=0.1 * jax.random.normal(kb1, (1, C), jnp.float32),
            g1=jnp.ones((1, C), jnp.float32),
            be1=jnp.zeros((1, C), jnp.float32),
            w2=(0.1 * jax.random.normal(k2, (KSIZE, C, C), jnp.float32)).astype(jnp.bfloat16),
            b2=0.1 * jax.random.normal(kb2, (1, C), jnp.float32),
            g2=jnp.ones((1, C), jnp.float32),
            be2=jnp.zeros((1, C), jnp.float32),
            # PyTorch init is 1e-8; use 0.1 so the residual-block path actually
            # contributes to the output and gets exercised by the correctness check.
            a=jnp.full((1, 1), 0.1, jnp.float32),
        ))
    key, ko, kp = jax.random.split(key, 3)
    return dict(
        blocks=blocks,
        dilations=dil,
        wo=0.05 * jax.random.normal(ko, (C, C), jnp.float32),   # (in, out)
        bo=jnp.full((1, C), 0.1, jnp.float32),
        wp=0.05 * jax.random.normal(kp, (C, F), jnp.float32),
        bp=jnp.full((1, F), 0.1, jnp.float32),
    )


# ------------------------- pure-JAX reference ------------------------------
def _ref_block(x, p, d):
    B, S, C = x.shape

    def conv(inp, w, b, dd):
        w = w.astype(jnp.float32)
        out = jnp.zeros_like(inp) + b
        for j in range(KSIZE):
            shift = (KSIZE - 1 - j) * dd
            if shift >= S:
                continue
            shifted = jnp.pad(inp[:, : S - shift, :], ((0, 0), (shift, 0), (0, 0)))
            out = out + jnp.dot(shifted, w[j], precision=_HP)
        return out

    def lnrelu(y, g, be):
        mu = y.mean(-1, keepdims=True)
        var = ((y - mu) ** 2).mean(-1, keepdims=True)
        return jnp.maximum((y - mu) / jnp.sqrt(var + LN_EPS) * g + be, 0.0)

    o1 = lnrelu(conv(x, p["w1"], p["b1"], d), p["g1"], p["be1"])
    o2 = lnrelu(conv(o1, p["w2"], p["b2"], 2 * d), p["g2"], p["be2"])
    return p["a"][0, 0] * o2 + x


def _ref_decoder(x, params):
    for blk, d in zip(params["blocks"], params["dilations"]):
        x = _ref_block(x, blk, d)
    h = jnp.dot(x, params["wo"], precision=_HP) + params["bo"]
    return jnp.dot(h, params["wp"], precision=_HP) + params["bp"]


# ----------------------------------- main ----------------------------------
if __name__ == "__main__":
    B, S, HIDDEN, FEAT = 2, 16, 32, 4
    BLOCK_NUM = 1
    DILATIONS = [1, 4]

    key = jax.random.PRNGKey(0)
    key, kx = jax.random.split(key)
    x = jax.random.normal(kx, (B, S, HIDDEN), jnp.float32)

    params = init_params(key, HIDDEN, FEAT, BLOCK_NUM, DILATIONS)
    packed = pack_decoder_params(params)

    out = jax.block_until_ready(decoder_forward(x, packed))
    assert out.shape == (B, S, FEAT), out.shape

    ref = _ref_decoder(x, params)
    err = float(jnp.max(jnp.abs(out - ref)))
    # bf16 MXU operands (weights + matmul LHS) vs. the pure-f32 reference.
    assert jnp.allclose(out, ref, rtol=1e-2, atol=1e-2), err

    print("KERNEL_OK")
</pallas_src>

<mosaic_0001>
module attributes {stable_mosaic.version = 11 : i64} {
  func.func @decoder_kernel(%arg0: i32, %arg1: memref<1x16x128xf32, #tpu.memory_space<vmem>>, %arg2: memref<2x3x128x128xbf16, #tpu.memory_space<vmem>>, %arg3: memref<2x3x128x128xbf16, #tpu.memory_space<vmem>>, %arg4: memref<2x8x128xf32, #tpu.memory_space<vmem>>, %arg5: memref<2xf32, #tpu.memory_space<smem>>, %arg6: memref<128x128xbf16, #tpu.memory_space<vmem>>, %arg7: memref<1x128xf32, #tpu.memory_space<vmem>>, %arg8: memref<1x16x128xf32, #tpu.memory_space<vmem>>) attributes {dimension_semantics = [#tpu.dimension_semantics<parallel>], iteration_bounds = array<i64: 2>, scalar_prefetch = 0 : i64, scratch_operands = 0 : i64, tpu.core_type = #tpu.core_type<tc>, window_params = [{transform_indices = @transform_0, window_bounds = array<i64: 1, 16, 128>}, {pipeline_mode = #tpu.pipeline_mode<synchronous>, transform_indices = @transform_1, window_bounds = array<i64: 2, 3, 128, 128>}, {pipeline_mode = #tpu.pipeline_mode<synchronous>, transform_indices = @transform_2, window_bounds = array<i64: 2, 3, 128, 128>}, {pipeline_mode = #tpu.pipeline_mode<synchronous>, transform_indices = @transform_3, window_bounds = array<i64: 2, 8, 128>}, {transform_indices = @transform_4, window_bounds = array<i64: 2>}, {pipeline_mode = #tpu.pipeline_mode<synchronous>, transform_indices = @transform_5, window_bounds = array<i64: 128, 128>}, {pipeline_mode = #tpu.pipeline_mode<synchronous>, transform_indices = @transform_6, window_bounds = array<i64: 1, 128>}, {transform_indices = @transform_7, window_bounds = array<i64: 1, 16, 128>}]} {
    %c0 = arith.constant 0 : index
    %c0_0 = arith.constant 0 : index
    %c0_1 = arith.constant 0 : index
    %0 = vector.load %arg1[%c0, %c0_0, %c0_1] : memref<1x16x128xf32, #tpu.memory_space<vmem>>, vector<1x16x128xf32>
    %1 = vector.shape_cast %0 : vector<1x16x128xf32> to vector<16x128xf32>
    %2 = tpu.iota {dimensions = array<i32: 0>} : vector<16x128xi32>
    %c0_2 = arith.constant 0 : index
    %c0_3 = arith.constant 0 : index
    %c0_4 = arith.constant 0 : index
    %3 = vector.load %arg4[%c0_2, %c0_3, %c0_4] : memref<2x8x128xf32, #tpu.memory_space<vmem>>, vector<1x8x128xf32>
    %4 = vector.shape_cast %3 : vector<1x8x128xf32> to vector<8x128xf32>
    %5 = vector.extract_strided_slice %4 {offsets = [0, 0], sizes = [1, 128], strides = [1, 1]} : vector<8x128xf32> to vector<1x128xf32>
    %6 = vector.extract_strided_slice %4 {offsets = [1, 0], sizes = [1, 128], strides = [1, 1]} : vector<8x128xf32> to vector<1x128xf32>
    %7 = vector.extract_strided_slice %4 {offsets = [2, 0], sizes = [1, 128], strides = [1, 1]} : vector<8x128xf32> to vector<1x128xf32>
    %8 = vector.extract_strided_slice %4 {offsets = [3, 0], sizes = [1, 128], strides = [1, 1]} : vector<8x128xf32> to vector<1x128xf32>
    %9 = vector.extract_strided_slice %4 {offsets = [4, 0], sizes = [1, 128], strides = [1, 1]} : vector<8x128xf32> to vector<1x128xf32>
    %10 = vector.extract_strided_slice %4 {offsets = [5, 0], sizes = [1, 128], strides = [1, 1]} : vector<8x128xf32> to vector<1x128xf32>
    %11 = arith.truncf %1 : vector<16x128xf32> to vector<16x128xbf16>
    %c0_i32 = arith.constant 0 : i32
    %c0_i32_5 = arith.constant 0 : i32
    %c0_i32_6 = arith.constant 0 : i32
    %c0_i32_7 = arith.constant 0 : i32
    %12 = tpu.memref_slice %arg2[%c0_i32, %c0_i32_5, %c0_i32_6, %c0_i32_7] : memref<2x3x128x128xbf16, #tpu.memory_space<vmem>> -> memref<1x3x128x128xbf16, #tpu.memory_space<vmem>>
    %13 = tpu.memref_squeeze %12 : memref<1x3x128x128xbf16, #tpu.memory_space<vmem>> -> memref<3x128x128xbf16, #tpu.memory_space<vmem>>
    %c2 = arith.constant 2 : index
    %c0_8 = arith.constant 0 : index
    %c0_9 = arith.constant 0 : index
    %14 = vector.load %13[%c2, %c0_8, %c0_9] : memref<3x128x128xbf16, #tpu.memory_space<vmem>>, vector<1x128x128xbf16>
    %15 = vector.shape_cast %14 : vector<1x128x128xbf16> to vector<128x128xbf16>
    %cst = arith.constant dense<0.000000e+00> : vector<16x128xf32>
    %16 = tpu.matmul %11, %15, %cst {dimension_numbers = #tpu.dot_dimension_numbers<[1], [0], [0], [1], [0, 0, 1, 1], [], []>} : vector<16x128xbf16>, vector<128x128xbf16>, vector<16x128xf32> -> vector<16x128xf32>
    %17 = vector.broadcast %5 : vector<1x128xf32> to vector<16x128xf32>
    %18 = arith.addf %16, %17 : vector<16x128xf32>
    %c0_i32_10 = arith.constant 0 : i32
    %c0_i32_11 = arith.constant 0 : i32
    %c0_i32_12 = arith.constant 0 : i32
    %c0_i32_13 = arith.constant 0 : i32
    %19 = tpu.memref_slice %arg2[%c0_i32_10, %c0_i32_11, %c0_i32_12, %c0_i32_13] : memref<2x3x128x128xbf16, #tpu.memory_space<vmem>> -> memref<1x3x128x128xbf16, #tpu.memory_space<vmem>>
    %20 = tpu.memref_squeeze %19 : memref<1x3x128x128xbf16, #tpu.memory_space<vmem>> -> memref<3x128x128xbf16, #tpu.memory_space<vmem>>
    %c0_14 = arith.constant 0 : index
    %c0_15 = arith.constant 0 : index
    %c0_16 = arith.constant 0 : index
    %21 = vector.load %20[%c0_14, %c0_15, %c0_16] : memref<3x128x128xbf16, #tpu.memory_space<vmem>>, vector<1x128x128xbf16>
    %22 = vector.shape_cast %21 : vector<1x128x128xbf16> to vector<128x128xbf16>
    %cst_17 = arith.constant dense<0.000000e+00> : vector<16x128xf32>
    %23 = tpu.matmul %11, %22, %cst_17 {dimension_numbers = #tpu.dot_dimension_numbers<[1], [0], [0], [1], [0, 0, 1, 1], [], []>} : vector<16x128xbf16>, vector<128x128xbf16>, vector<16x128xf32> -> vector<16x128xf32>
    %c2_i32 = arith.constant 2 : i32
    %24 = tpu.dynamic_rotate %23 by %c2_i32 dim 0 : vector<16x128xf32>, i32 -> vector<16x128xf32>
    %c2_i32_18 = arith.constant 2 : i32
    %25 = vector.broadcast %c2_i32_18 : i32 to vector<16x128xi32>
    %26 = arith.cmpi sge, %2, %25 : vector<16x128xi32>
    %cst_19 = arith.constant 0.000000e+00 : f32
    %27 = vector.broadcast %cst_19 : f32 to vector<16x128xf32>
    %28 = arith.select %26, %24, %27 : vector<16x128xi1>, vector<16x128xf32>
    %29 = arith.addf %18, %28 : vector<16x128xf32>
    %c0_i32_20 = arith.constant 0 : i32
    %c0_i32_21 = arith.constant 0 : i32
    %c0_i32_22 = arith.constant 0 : i32
    %c0_i32_23 = arith.constant 0 : i32
    %30 = tpu.memref_slice %arg2[%c0_i32_20, %c0_i32_21, %c0_i32_22, %c0_i32_23] : memref<2x3x128x128xbf16, #tpu.memory_space<vmem>> -> memref<1x3x128x128xbf16, #tpu.memory_space<vmem>>
    %31 = tpu.memref_squeeze %30 : memref<1x3x128x128xbf16, #tpu.memory_space<vmem>> -> memref<3x128x128xbf16, #tpu.memory_space<vmem>>
    %c1 = arith.constant 1 : index
    %c0_24 = arith.constant 0 : index
    %c0_25 = arith.constant 0 : index
    %32 = vector.load %31[%c1, %c0_24, %c0_25] : memref<3x128x128xbf16, #tpu.memory_space<vmem>>, vector<1x128x128xbf16>
    %33 = vector.shape_cast %32 : vector<1x128x128xbf16> to vector<128x128xbf16>
    %cst_26 = arith.constant dense<0.000000e+00> : vector<16x128xf32>
    %34 = tpu.matmul %11, %33, %cst_26 {dimension_numbers = #tpu.dot_dimension_numbers<[1], [0], [0], [1], [0, 0, 1, 1], [], []>} : vector<16x128xbf16>, vector<128x128xbf16>, vector<16x128xf32> -> vector<16x128xf32>
    %c1_i32 = arith.constant 1 : i32
    %35 = tpu.dynamic_rotate %34 by %c1_i32 dim 0 : vector<16x128xf32>, i32 -> vector<16x128xf32>
    %c1_i32_27 = arith.constant 1 : i32
    %36 = vector.broadcast %c1_i32_27 : i32 to vector<16x128xi32>
    %37 = arith.cmpi sge, %2, %36 : vector<16x128xi32>
    %cst_28 = arith.constant 0.000000e+00 : f32
    %38 = vector.broadcast %cst_28 : f32 to vector<16x128xf32>
    %39 = arith.select %37, %35, %38 : vector<16x128xi1>, vector<16x128xf32>
    %40 = arith.addf %29, %39 : vector<16x128xf32>
    %cst_29 = arith.constant dense<0.000000e+00> : vector<16xf32>
    %41 = vector.multi_reduction <add>, %40, %cst_29 [1] : vector<16x128xf32> to vector<16xf32>
    %42 = vector.shape_cast %41 : vector<16xf32> to vector<16x1xf32>
    %cst_30 = arith.constant 3.125000e-02 : f32
    %43 = vector.broadcast %cst_30 : f32 to vector<16x1xf32>
    %44 = arith.mulf %42, %43 : vector<16x1xf32>
    %45 = arith.mulf %40, %40 : vector<16x128xf32>
    %cst_31 = arith.constant dense<0.000000e+00> : vector<16xf32>
    %46 = vector.multi_reduction <add>, %45, %cst_31 [1] : vector<16x128xf32> to vector<16xf32>
    %47 = vector.shape_cast %46 : vector<16xf32> to vector<16x1xf32>
    %cst_32 = arith.constant 3.125000e-02 : f32
    %48 = vector.broadcast %cst_32 : f32 to vector<16x1xf32>
    %49 = arith.mulf %47, %48 : vector<16x1xf32>
    %50 = arith.mulf %44, %44 : vector<16x1xf32>
    %51 = arith.subf %49, %50 : vector<16x1xf32>
    %cst_33 = arith.constant 0.000000e+00 : f32
    %52 = vector.broadcast %cst_33 : f32 to vector<16x1xf32>
    %53 = arith.maximumf %51, %52 : vector<16x1xf32>
    %cst_34 = arith.constant 9.99999993E-9 : f32
    %54 = vector.broadcast %cst_34 : f32 to vector<16x1xf32>
    %55 = arith.addf %53, %54 : vector<16x1xf32>
    %56 = math.rsqrt %55 : vector<16x1xf32>
    %57 = vector.broadcast %56 : vector<16x1xf32> to vector<16x128xf32>
    %58 = vector.broadcast %6 : vector<1x128xf32> to vector<16x128xf32>
    %59 = arith.mulf %57, %58 : vector<16x128xf32>
    %60 = vector.broadcast %44 : vector<16x1xf32> to vector<16x128xf32>
    %61 = arith.subf %40, %60 : vector<16x128xf32>
    %62 = arith.mulf %61, %59 : vector<16x128xf32>
    %63 = vector.broadcast %7 : vector<1x128xf32> to vector<16x128xf32>
    %64 = arith.addf %62, %63 : vector<16x128xf32>
    %cst_35 = arith.constant 0.000000e+00 : f32
    %65 = vector.broadcast %cst_35 : f32 to vector<16x128xf32>
    %66 = arith.maximumf %64, %65 : vector<16x128xf32>
    %67 = arith.truncf %66 : vector<16x128xf32> to vector<16x128xbf16>
    %c0_i32_36 = arith.constant 0 : i32
    %c0_i32_37 = arith.constant 0 : i32
    %c0_i32_38 = arith.constant 0 : i32
    %c0_i32_39 = arith.constant 0 : i32
    %68 = tpu.memref_slice %arg3[%c0_i32_36, %c0_i32_37, %c0_i32_38, %c0_i32_39] : memref<2x3x128x128xbf16, #tpu.memory_space<vmem>> -> memref<1x3x128x128xbf16, #tpu.memory_space<vmem>>
    %69 = tpu.memref_squeeze %68 : memref<1x3x128x128xbf16, #tpu.memory_space<vmem>> -> memref<3x128x128xbf16, #tpu.memory_space<vmem>>
    %c2_40 = arith.constant 2 : index
    %c0_41 = arith.constant 0 : index
    %c0_42 = arith.constant 0 : index
    %70 = vector.load %69[%c2_40, %c0_41, %c0_42] : memref<3x128x128xbf16, #tpu.memory_space<vmem>>, vector<1x128x128xbf16>
    %71 = vector.shape_cast %70 : vector<1x128x128xbf16> to vector<128x128xbf16>
    %cst_43 = arith.constant dense<0.000000e+00> : vector<16x128xf32>
    %72 = tpu.matmul %67, %71, %cst_43 {dimension_numbers = #tpu.dot_dimension_numbers<[1], [0], [0], [1], [0, 0, 1, 1], [], []>} : vector<16x128xbf16>, vector<128x128xbf16>, vector<16x128xf32> -> vector<16x128xf32>
    %73 = vector.broadcast %8 : vector<1x128xf32> to vector<16x128xf32>
    %74 = arith.addf %72, %73 : vector<16x128xf32>
    %c0_i32_44 = arith.constant 0 : i32
    %c0_i32_45 = arith.constant 0 : i32
    %c0_i32_46 = arith.constant 0 : i32
    %c0_i32_47 = arith.constant 0 : i32
    %75 = tpu.memref_slice %arg3[%c0_i32_44, %c0_i32_45, %c0_i32_46, %c0_i32_47] : memref<2x3x128x128xbf16, #tpu.memory_space<vmem>> -> memref<1x3x128x128xbf16, #tpu.memory_space<vmem>>
    %76 = tpu.memref_squeeze %75 : memref<1x3x128x128xbf16, #tpu.memory_space<vmem>> -> memref<3x128x128xbf16, #tpu.memory_space<vmem>>
    %c0_48 = arith.constant 0 : index
    %c0_49 = arith.constant 0 : index
    %c0_50 = arith.constant 0 : index
    %77 = vector.load %76[%c0_48, %c0_49, %c0_50] : memref<3x128x128xbf16, #tpu.memory_space<vmem>>, vector<1x128x128xbf16>
    %78 = vector.shape_cast %77 : vector<1x128x128xbf16> to vector<128x128xbf16>
    %cst_51 = arith.constant dense<0.000000e+00> : vector<16x128xf32>
    %79 = tpu.matmul %67, %78, %cst_51 {dimension_numbers = #tpu.dot_dimension_numbers<[1], [0], [0], [1], [0, 0, 1, 1], [], []>} : vector<16x128xbf16>, vector<128x128xbf16>, vector<16x128xf32> -> vector<16x128xf32>
    %c4_i32 = arith.constant 4 : i32
    %80 = tpu.dynamic_rotate %79 by %c4_i32 dim 0 : vector<16x128xf32>, i32 -> vector<16x128xf32>
    %c4_i32_52 = arith.constant 4 : i32
    %81 = vector.broadcast %c4_i32_52 : i32 to vector<16x128xi32>
    %82 = arith.cmpi sge, %2, %81 : vector<16x128xi32>
    %cst_53 = arith.constant 0.000000e+00 : f32
    %83 = vector.broadcast %cst_53 : f32 to vector<16x128xf32>
    %84 = arith.select %82, %80, %83 : vector<16x128xi1>, vector<16x128xf32>
    %85 = arith.addf %74, %84 : vector<16x128xf32>
    %c0_i32_54 = arith.constant 0 : i32
    %c0_i32_55 = arith.constant 0 : i32
    %c0_i32_56 = arith.constant 0 : i32
    %c0_i32_57 = arith.constant 0 : i32
    %86 = tpu.memref_slice %arg3[%c0_i32_54, %c0_i32_55, %c0_i32_56, %c0_i32_57] : memref<2x3x128x128xbf16, #tpu.memory_space<vmem>> -> memref<1x3x128x128xbf16, #tpu.memory_space<vmem>>
    %87 = tpu.memref_squeeze %86 : memref<1x3x128x128xbf16, #tpu.memory_space<vmem>> -> memref<3x128x128xbf16, #tpu.memory_space<vmem>>
    %c1_58 = arith.constant 1 : index
    %c0_59 = arith.constant 0 : index
    %c0_60 = arith.constant 0 : index
    %88 = vector.load %87[%c1_58, %c0_59, %c0_60] : memref<3x128x128xbf16, #tpu.memory_space<vmem>>, vector<1x128x128xbf16>
    %89 = vector.shape_cast %88 : vector<1x128x128xbf16> to vector<128x128xbf16>
    %cst_61 = arith.constant dense<0.000000e+00> : vector<16x128xf32>
    %90 = tpu.matmul %67, %89, %cst_61 {dimension_numbers = #tpu.dot_dimension_numbers<[1], [0], [0], [1], [0, 0, 1, 1], [], []>} : vector<16x128xbf16>, vector<128x128xbf16>, vector<16x128xf32> -> vector<16x128xf32>
    %c2_i32_62 = arith.constant 2 : i32
    %91 = tpu.dynamic_rotate %90 by %c2_i32_62 dim 0 : vector<16x128xf32>, i32 -> vector<16x128xf32>
    %c2_i32_63 = arith.constant 2 : i32
    %92 = vector.broadcast %c2_i32_63 : i32 to vector<16x128xi32>
    %93 = arith.cmpi sge, %2, %92 : vector<16x128xi32>
    %cst_64 = arith.constant 0.000000e+00 : f32
    %94 = vector.broadcast %cst_64 : f32 to vector<16x128xf32>
    %95 = arith.select %93, %91, %94 : vector<16x128xi1>, vector<16x128xf32>
    %96 = arith.addf %85, %95 : vector<16x128xf32>
    %cst_65 = arith.constant dense<0.000000e+00> : vector<16xf32>
    %97 = vector.multi_reduction <add>, %96, %cst_65 [1] : vector<16x128xf32> to vector<16xf32>
    %98 = vector.shape_cast %97 : vector<16xf32> to vector<16x1xf32>
    %cst_66 = arith.constant 3.125000e-02 : f32
    %99 = vector.broadcast %cst_66 : f32 to vector<16x1xf32>
    %100 = arith.mulf %98, %99 : vector<16x1xf32>
    %101 = arith.mulf %96, %96 : vector<16x128xf32>
    %cst_67 = arith.constant dense<0.000000e+00> : vector<16xf32>
    %102 = vector.multi_reduction <add>, %101, %cst_67 [1] : vector<16x128xf32> to vector<16xf32>
    %103 = vector.shape_cast %102 : vector<16xf32> to vector<16x1xf32>
    %cst_68 = arith.constant 3.125000e-02 : f32
    %104 = vector.broadcast %cst_68 : f32 to vector<16x1xf32>
    %105 = arith.mulf %103, %104 : vector<16x1xf32>
    %106 = arith.mulf %100, %100 : vector<16x1xf32>
    %107 = arith.subf %105, %106 : vector<16x1xf32>
    %cst_69 = arith.constant 0.000000e+00 : f32
    %108 = vector.broadcast %cst_69 : f32 to vector<16x1xf32>
    %109 = arith.maximumf %107, %108 : vector<16x1xf32>
    %cst_70 = arith.constant 9.99999993E-9 : f32
    %110 = vector.broadcast %cst_70 : f32 to vector<16x1xf32>
    %111 = arith.addf %109, %110 : vector<16x1xf32>
    %112 = math.rsqrt %111 : vector<16x1xf32>
    %113 = vector.broadcast %112 : vector<16x1xf32> to vector<16x128xf32>
    %114 = vector.broadcast %9 : vector<1x128xf32> to vector<16x128xf32>
    %115 = arith.mulf %113, %114 : vector<16x128xf32>
    %116 = vector.broadcast %100 : vector<16x1xf32> to vector<16x128xf32>
    %117 = arith.subf %96, %116 : vector<16x128xf32>
    %118 = arith.mulf %117, %115 : vector<16x128xf32>
    %119 = vector.broadcast %10 : vector<1x128xf32> to vector<16x128xf32>
    %120 = arith.addf %118, %119 : vector<16x128xf32>
    %cst_71 = arith.constant 0.000000e+00 : f32
    %121 = vector.broadcast %cst_71 : f32 to vector<16x128xf32>
    %122 = arith.maximumf %120, %121 : vector<16x128xf32>
    %c0_72 = arith.constant 0 : index
    %123 = memref.load %arg5[%c0_72] : memref<2xf32, #tpu.memory_space<smem>>
    %124 = vector.broadcast %123 : f32 to vector<16x128xf32>
    %125 = arith.mulf %124, %122 : vector<16x128xf32>
    %126 = arith.addf %125, %1 : vector<16x128xf32>
    %c1_73 = arith.constant 1 : index
    %c0_74 = arith.constant 0 : index
    %c0_75 = arith.constant 0 : index
    %127 = vector.load %arg4[%c1_73, %c0_74, %c0_75] : memref<2x8x128xf32, #tpu.memory_space<vmem>>, vector<1x8x128xf32>
    %128 = vector.shape_cast %127 : vector<1x8x128xf32> to vector<8x128xf32>
    %129 = vector.extract_strided_slice %128 {offsets = [0, 0], sizes = [1, 128], strides = [1, 1]} : vector<8x128xf32> to vector<1x128xf32>
    %130 = vector.extract_strided_slice %128 {offsets = [1, 0], sizes = [1, 128], strides = [1, 1]} : vector<8x128xf32> to vector<1x128xf32>
    %131 = vector.extract_strided_slice %128 {offsets = [2, 0], sizes = [1, 128], strides = [1, 1]} : vector<8x128xf32> to vector<1x128xf32>
    %132 = vector.extract_strided_slice %128 {offsets = [3, 0], sizes = [1, 128], strides = [1, 1]} : vector<8x128xf32> to vector<1x128xf32>
    %133 = vector.extract_strided_slice %128 {offsets = [4, 0], sizes = [1, 128], strides = [1, 1]} : vector<8x128xf32> to vector<1x128xf32>
    %134 = vector.extract_strided_slice %128 {offsets = [5, 0], sizes = [1, 128], strides = [1, 1]} : vector<8x128xf32> to vector<1x128xf32>
    %135 = arith.truncf %126 : vector<16x128xf32> to vector<16x128xbf16>
    %c1_i32_76 = arith.constant 1 : i32
    %c0_i32_77 = arith.constant 0 : i32
    %c0_i32_78 = arith.constant 0 : i32
    %c0_i32_79 = arith.constant 0 : i32
    %136 = tpu.memref_slice %arg2[%c1_i32_76, %c0_i32_77, %c0_i32_78, %c0_i32_79] : memref<2x3x128x128xbf16, #tpu.memory_space<vmem>> -> memref<1x3x128x128xbf16, #tpu.memory_space<vmem>>
    %137 = tpu.memref_squeeze %136 : memref<1x3x128x128xbf16, #tpu.memory_space<vmem>> -> memref<3x128x128xbf16, #tpu.memory_space<vmem>>
    %c2_80 = arith.constant 2 : index
    %c0_81 = arith.constant 0 : index
    %c0_82 = arith.constant 0 : index
    %138 = vector.load %137[%c2_80, %c0_81, %c0_82] : memref<3x128x128xbf16, #tpu.memory_space<vmem>>, vector<1x128x128xbf16>
    %139 = vector.shape_cast %138 : vector<1x128x128xbf16> to vector<128x128xbf16>
    %cst_83 = arith.constant dense<0.000000e+00> : vector<16x128xf32>
    %140 = tpu.matmul %135, %139, %cst_83 {dimension_numbers = #tpu.dot_dimension_numbers<[1], [0], [0], [1], [0, 0, 1, 1], [], []>} : vector<16x128xbf16>, vector<128x128xbf16>, vector<16x128xf32> -> vector<16x128xf32>
    %141 = vector.broadcast %129 : vector<1x128xf32> to vector<16x128xf32>
    %142 = arith.addf %140, %141 : vector<16x128xf32>
    %c1_i32_84 = arith.constant 1 : i32
    %c0_i32_85 = arith.constant 0 : i32
    %c0_i32_86 = arith.constant 0 : i32
    %c0_i32_87 = arith.constant 0 : i32
    %143 = tpu.memref_slice %arg2[%c1_i32_84, %c0_i32_85, %c0_i32_86, %c0_i32_87] : memref<2x3x128x128xbf16, #tpu.memory_space<vmem>> -> memref<1x3x128x128xbf16, #tpu.memory_space<vmem>>
    %144 = tpu.memref_squeeze %143 : memref<1x3x128x128xbf16, #tpu.memory_space<vmem>> -> memref<3x128x128xbf16, #tpu.memory_space<vmem>>
    %c0_88 = arith.constant 0 : index
    %c0_89 = arith.constant 0 : index
    %c0_90 = arith.constant 0 : index
    %145 = vector.load %144[%c0_88, %c0_89, %c0_90] : memref<3x128x128xbf16, #tpu.memory_space<vmem>>, vector<1x128x128xbf16>
    %146 = vector.shape_cast %145 : vector<1x128x128xbf16> to vector<128x128xbf16>
    %cst_91 = arith.constant dense<0.000000e+00> : vector<16x128xf32>
    %147 = tpu.matmul %135, %146, %cst_91 {dimension_numbers = #tpu.dot_dimension_numbers<[1], [0], [0], [1], [0, 0, 1, 1], [], []>} : vector<16x128xbf16>, vector<128x128xbf16>, vector<16x128xf32> -> vector<16x128xf32>
    %c8_i32 = arith.constant 8 : i32
    %148 = tpu.dynamic_rotate %147 by %c8_i32 dim 0 : vector<16x128xf32>, i32 -> vector<16x128xf32>
    %c8_i32_92 = arith.constant 8 : i32
    %149 = vector.broadcast %c8_i32_92 : i32 to vector<16x128xi32>
    %150 = arith.cmpi sge, %2, %149 : vector<16x128xi32>
    %cst_93 = arith.constant 0.000000e+00 : f32
    %151 = vector.broadcast %cst_93 : f32 to vector<16x128xf32>
    %152 = arith.select %150, %148, %151 : vector<16x128xi1>, vector<16x128xf32>
    %153 = arith.addf %142, %152 : vector<16x128xf32>
    %c1_i32_94 = arith.constant 1 : i32
    %c0_i32_95 = arith.constant 0 : i32
    %c0_i32_96 = arith.constant 0 : i32
    %c0_i32_97 = arith.constant 0 : i32
    %154 = tpu.memref_slice %arg2[%c1_i32_94, %c0_i32_95, %c0_i32_96, %c0_i32_97] : memref<2x3x128x128xbf16, #tpu.memory_space<vmem>> -> memref<1x3x128x128xbf16, #tpu.memory_space<vmem>>
    %155 = tpu.memref_squeeze %154 : memref<1x3x128x128xbf16, #tpu.memory_space<vmem>> -> memref<3x128x128xbf16, #tpu.memory_space<vmem>>
    %c1_98 = arith.constant 1 : index
    %c0_99 = arith.constant 0 : index
    %c0_100 = arith.constant 0 : index
    %156 = vector.load %155[%c1_98, %c0_99, %c0_100] : memref<3x128x128xbf16, #tpu.memory_space<vmem>>, vector<1x128x128xbf16>
    %157 = vector.shape_cast %156 : vector<1x128x128xbf16> to vector<128x128xbf16>
    %cst_101 = arith.constant dense<0.000000e+00> : vector<16x128xf32>
    %158 = tpu.matmul %135, %157, %cst_101 {dimension_numbers = #tpu.dot_dimension_numbers<[1], [0], [0], [1], [0, 0, 1, 1], [], []>} : vector<16x128xbf16>, vector<128x128xbf16>, vector<16x128xf32> -> vector<16x128xf32>
    %c4_i32_102 = arith.constant 4 : i32
    %159 = tpu.dynamic_rotate %158 by %c4_i32_102 dim 0 : vector<16x128xf32>, i32 -> vector<16x128xf32>
    %c4_i32_103 = arith.constant 4 : i32
    %160 = vector.broadcast %c4_i32_103 : i32 to vector<16x128xi32>
    %161 = arith.cmpi sge, %2, %160 : vector<16x128xi32>
    %cst_104 = arith.constant 0.000000e+00 : f32
    %162 = vector.broadcast %cst_104 : f32 to vector<16x128xf32>
    %163 = arith.select %161, %159, %162 : vector<16x128xi1>, vector<16x128xf32>
    %164 = arith.addf %153, %163 : vector<16x128xf32>
    %cst_105 = arith.constant dense<0.000000e+00> : vector<16xf32>
    %165 = vector.multi_reduction <add>, %164, %cst_105 [1] : vector<16x128xf32> to vector<16xf32>
    %166 = vector.shape_cast %165 : vector<16xf32> to vector<16x1xf32>
    %cst_106 = arith.constant 3.125000e-02 : f32
    %167 = vector.broadcast %cst_106 : f32 to vector<16x1xf32>
    %168 = arith.mulf %166, %167 : vector<16x1xf32>
    %169 = arith.mulf %164, %164 : vector<16x128xf32>
    %cst_107 = arith.constant dense<0.000000e+00> : vector<16xf32>
    %170 = vector.multi_reduction <add>, %169, %cst_107 [1] : vector<16x128xf32> to vector<16xf32>
    %171 = vector.shape_cast %170 : vector<16xf32> to vector<16x1xf32>
    %cst_108 = arith.constant 3.125000e-02 : f32
    %172 = vector.broadcast %cst_108 : f32 to vector<16x1xf32>
    %173 = arith.mulf %171, %172 : vector<16x1xf32>
    %174 = arith.mulf %168, %168 : vector<16x1xf32>
    %175 = arith.subf %173, %174 : vector<16x1xf32>
    %cst_109 = arith.constant 0.000000e+00 : f32
    %176 = vector.broadcast %cst_109 : f32 to vector<16x1xf32>
    %177 = arith.maximumf %175, %176 : vector<16x1xf32>
    %cst_110 = arith.constant 9.99999993E-9 : f32
    %178 = vector.broadcast %cst_110 : f32 to vector<16x1xf32>
    %179 = arith.addf %177, %178 : vector<16x1xf32>
    %180 = math.rsqrt %179 : vector<16x1xf32>
    %181 = vector.broadcast %180 : vector<16x1xf32> to vector<16x128xf32>
    %182 = vector.broadcast %130 : vector<1x128xf32> to vector<16x128xf32>
    %183 = arith.mulf %181, %182 : vector<16x128xf32>
    %184 = vector.broadcast %168 : vector<16x1xf32> to vector<16x128xf32>
    %185 = arith.subf %164, %184 : vector<16x128xf32>
    %186 = arith.mulf %185, %183 : vector<16x128xf32>
    %187 = vector.broadcast %131 : vector<1x128xf32> to vector<16x128xf32>
    %188 = arith.addf %186, %187 : vector<16x128xf32>
    %cst_111 = arith.constant 0.000000e+00 : f32
    %189 = vector.broadcast %cst_111 : f32 to vector<16x128xf32>
    %190 = arith.maximumf %188, %189 : vector<16x128xf32>
    %191 = arith.truncf %190 : vector<16x128xf32> to vector<16x128xbf16>
    %c1_i32_112 = arith.constant 1 : i32
    %c0_i32_113 = arith.constant 0 : i32
    %c0_i32_114 = arith.constant 0 : i32
    %c0_i32_115 = arith.constant 0 : i32
    %192 = tpu.memref_slice %arg3[%c1_i32_112, %c0_i32_113, %c0_i32_114, %c0_i32_115] : memref<2x3x128x128xbf16, #tpu.memory_space<vmem>> -> memref<1x3x128x128xbf16, #tpu.memory_space<vmem>>
    %193 = tpu.memref_squeeze %192 : memref<1x3x128x128xbf16, #tpu.memory_space<vmem>> -> memref<3x128x128xbf16, #tpu.memory_space<vmem>>
    %c2_116 = arith.constant 2 : index
    %c0_117 = arith.constant 0 : index
    %c0_118 = arith.constant 0 : index
    %194 = vector.load %193[%c2_116, %c0_117, %c0_118] : memref<3x128x128xbf16, #tpu.memory_space<vmem>>, vector<1x128x128xbf16>
    %195 = vector.shape_cast %194 : vector<1x128x128xbf16> to vector<128x128xbf16>
    %cst_119 = arith.constant dense<0.000000e+00> : vector<16x128xf32>
    %196 = tpu.matmul %191, %195, %cst_119 {dimension_numbers = #tpu.dot_dimension_numbers<[1], [0], [0], [1], [0, 0, 1, 1], [], []>} : vector<16x128xbf16>, vector<128x128xbf16>, vector<16x128xf32> -> vector<16x128xf32>
    %197 = vector.broadcast %132 : vector<1x128xf32> to vector<16x128xf32>
    %198 = arith.addf %196, %197 : vector<16x128xf32>
    %c1_i32_120 = arith.constant 1 : i32
    %c0_i32_121 = arith.constant 0 : i32
    %c0_i32_122 = arith.constant 0 : i32
    %c0_i32_123 = arith.constant 0 : i32
    %199 = tpu.memref_slice %arg3[%c1_i32_120, %c0_i32_121, %c0_i32_122, %c0_i32_123] : memref<2x3x128x128xbf16, #tpu.memory_space<vmem>> -> memref<1x3x128x128xbf16, #tpu.memory_space<vmem>>
    %200 = tpu.memref_squeeze %199 : memref<1x3x128x128xbf16, #tpu.memory_space<vmem>> -> memref<3x128x128xbf16, #tpu.memory_space<vmem>>
    %c1_124 = arith.constant 1 : index
    %c0_125 = arith.constant 0 : index
    %c0_126 = arith.constant 0 : index
    %201 = vector.load %200[%c1_124, %c0_125, %c0_126] : memref<3x128x128xbf16, #tpu.memory_space<vmem>>, vector<1x128x128xbf16>
    %202 = vector.shape_cast %201 : vector<1x128x128xbf16> to vector<128x128xbf16>
    %cst_127 = arith.constant dense<0.000000e+00> : vector<16x128xf32>
    %203 = tpu.matmul %191, %202, %cst_127 {dimension_numbers = #tpu.dot_dimension_numbers<[1], [0], [0], [1], [0, 0, 1, 1], [], []>} : vector<16x128xbf16>, vector<128x128xbf16>, vector<16x128xf32> -> vector<16x128xf32>
    %c8_i32_128 = arith.constant 8 : i32
    %204 = tpu.dynamic_rotate %203 by %c8_i32_128 dim 0 : vector<16x128xf32>, i32 -> vector<16x128xf32>
    %c8_i32_129 = arith.constant 8 : i32
    %205 = vector.broadcast %c8_i32_129 : i32 to vector<16x128xi32>
    %206 = arith.cmpi sge, %2, %205 : vector<16x128xi32>
    %cst_130 = arith.constant 0.000000e+00 : f32
    %207 = vector.broadcast %cst_130 : f32 to vector<16x128xf32>
    %208 = arith.select %206, %204, %207 : vector<16x128xi1>, vector<16x128xf32>
    %209 = arith.addf %198, %208 : vector<16x128xf32>
    %cst_131 = arith.constant dense<0.000000e+00> : vector<16xf32>
    %210 = vector.multi_reduction <add>, %209, %cst_131 [1] : vector<16x128xf32> to vector<16xf32>
    %211 = vector.shape_cast %210 : vector<16xf32> to vector<16x1xf32>
    %cst_132 = arith.constant 3.125000e-02 : f32
    %212 = vector.broadcast %cst_132 : f32 to vector<16x1xf32>
    %213 = arith.mulf %211, %212 : vector<16x1xf32>
    %214 = arith.mulf %209, %209 : vector<16x128xf32>
    %cst_133 = arith.constant dense<0.000000e+00> : vector<16xf32>
    %215 = vector.multi_reduction <add>, %214, %cst_133 [1] : vector<16x128xf32> to vector<16xf32>
    %216 = vector.shape_cast %215 : vector<16xf32> to vector<16x1xf32>
    %cst_134 = arith.constant 3.125000e-02 : f32
    %217 = vector.broadcast %cst_134 : f32 to vector<16x1xf32>
    %218 = arith.mulf %216, %217 : vector<16x1xf32>
    %219 = arith.mulf %213, %213 : vector<16x1xf32>
    %220 = arith.subf %218, %219 : vector<16x1xf32>
    %cst_135 = arith.constant 0.000000e+00 : f32
    %221 = vector.broadcast %cst_135 : f32 to vector<16x1xf32>
    %222 = arith.maximumf %220, %221 : vector<16x1xf32>
    %cst_136 = arith.constant 9.99999993E-9 : f32
    %223 = vector.broadcast %cst_136 : f32 to vector<16x1xf32>
    %224 = arith.addf %222, %223 : vector<16x1xf32>
    %225 = math.rsqrt %224 : vector<16x1xf32>
    %226 = vector.broadcast %225 : vector<16x1xf32> to vector<16x128xf32>
    %227 = vector.broadcast %133 : vector<1x128xf32> to vector<16x128xf32>
    %228 = arith.mulf %226, %227 : vector<16x128xf32>
    %229 = vector.broadcast %213 : vector<16x1xf32> to vector<16x128xf32>
    %230 = arith.subf %209, %229 : vector<16x128xf32>
    %231 = arith.mulf %230, %228 : vector<16x128xf32>
    %232 = vector.broadcast %134 : vector<1x128xf32> to vector<16x128xf32>
    %233 = arith.addf %231, %232 : vector<16x128xf32>
    %cst_137 = arith.constant 0.000000e+00 : f32
    %234 = vector.broadcast %cst_137 : f32 to vector<16x128xf32>
    %235 = arith.maximumf %233, %234 : vector<16x128xf32>
    %c1_138 = arith.constant 1 : index
    %236 = memref.load %arg5[%c1_138] : memref<2xf32, #tpu.memory_space<smem>>
    %237 = vector.broadcast %236 : f32 to vector<16x128xf32>
    %238 = arith.mulf %237, %235 : vector<16x128xf32>
    %239 = arith.addf %238, %126 : vector<16x128xf32>
    %240 = arith.truncf %239 : vector<16x128xf32> to vector<16x128xbf16>
    %c0_139 = arith.constant 0 : index
    %c0_140 = arith.constant 0 : index
    %241 = vector.load %arg6[%c0_139, %c0_140] : memref<128x128xbf16, #tpu.memory_space<vmem>>, vector<128x128xbf16>
    %cst_141 = arith.constant dense<0.000000e+00> : vector<16x128xf32>
    %242 = tpu.matmul %240, %241, %cst_141 {dimension_numbers = #tpu.dot_dimension_numbers<[1], [0], [0], [1], [0, 0, 1, 1], [], []>} : vector<16x128xbf16>, vector<128x128xbf16>, vector<16x128xf32> -> vector<16x128xf32>
    %c0_142 = arith.constant 0 : index
    %c0_143 = arith.constant 0 : index
    %243 = vector.load %arg7[%c0_142, %c0_143] : memref<1x128xf32, #tpu.memory_space<vmem>>, vector<1x128xf32>
    %244 = vector.broadcast %243 : vector<1x128xf32> to vector<16x128xf32>
    %245 = arith.addf %242, %244 : vector<16x128xf32>
    %c0_144 = arith.constant 0 : index
    %c0_145 = arith.constant 0 : index
    %c0_146 = arith.constant 0 : index
    %246 = vector.load %arg8[%c0_144, %c0_145, %c0_146] : memref<1x16x128xf32, #tpu.memory_space<vmem>>, vector<1x16x128xf32>
    %247 = vector.shape_cast %246 : vector<1x16x128xf32> to vector<16x128xf32>
    %248 = vector.shape_cast %245 : vector<16x128xf32> to vector<1x16x128xf32>
    tpu.vector_store %arg8[%c0_144, %c0_145, %c0_146], %248 {strides = array<i32>} : memref<1x16x128xf32, #tpu.memory_space<vmem>>, vector<1x16x128xf32>,
    return
  }
  func.func @transform_0(%arg0: i32) -> (i32, i32, i32) {
    %c0_i32 = arith.constant 0 : i32
    %c0_i32_0 = arith.constant 0 : i32
    %c0_i32_1 = arith.constant 0 : i32
    return %arg0, %c0_i32, %c0_i32_0 : i32, i32, i32
  }
  func.func @transform_1(%arg0: i32) -> (i32, i32, i32, i32) {
    %c0_i32 = arith.constant 0 : i32
    %c0_i32_0 = arith.constant 0 : i32
    %c0_i32_1 = arith.constant 0 : i32
    %c0_i32_2 = arith.constant 0 : i32
    %c0_i32_3 = arith.constant 0 : i32
    return %c0_i32, %c0_i32_0, %c0_i32_1, %c0_i32_2 : i32, i32, i32, i32
  }
  func.func @transform_2(%arg0: i32) -> (i32, i32, i32, i32) {
    %c0_i32 = arith.constant 0 : i32
    %c0_i32_0 = arith.constant 0 : i32
    %c0_i32_1 = arith.constant 0 : i32
    %c0_i32_2 = arith.constant 0 : i32
    %c0_i32_3 = arith.constant 0 : i32
    return %c0_i32, %c0_i32_0, %c0_i32_1, %c0_i32_2 : i32, i32, i32, i32
  }
  func.func @transform_3(%arg0: i32) -> (i32, i32, i32) {
    %c0_i32 = arith.constant 0 : i32
    %c0_i32_0 = arith.constant 0 : i32
    %c0_i32_1 = arith.constant 0 : i32
    %c0_i32_2 = arith.constant 0 : i32
    return %c0_i32, %c0_i32_0, %c0_i32_1 : i32, i32, i32
  }
  func.func @transform_4(%arg0: i32) -> i32 {
    %c0_i32 = arith.constant 0 : i32
    %c0_i32_0 = arith.constant 0 : i32
    return %c0_i32 : i32
  }
  func.func @transform_5(%arg0: i32) -> (i32, i32) {
    %c0_i32 = arith.constant 0 : i32
    %c0_i32_0 = arith.constant 0 : i32
    %c0_i32_1 = arith.constant 0 : i32
    return %c0_i32, %c0_i32_0 : i32, i32
  }
  func.func @transform_6(%arg0: i32) -> (i32, i32) {
    %c0_i32 = arith.constant 0 : i32
    %c0_i32_0 = arith.constant 0 : i32
    %c0_i32_1 = arith.constant 0 : i32
    return %c0_i32, %c0_i32_0 : i32, i32
  }
  func.func @transform_7(%arg0: i32) -> (i32, i32, i32) {
    %c0_i32 = arith.constant 0 : i32
    %c0_i32_0 = arith.constant 0 : i32
    %c0_i32_1 = arith.constant 0 : i32
    return %arg0, %c0_i32, %c0_i32_0 : i32, i32, i32
  }
}

</mosaic_0001>

<bundles_post_ra>
// kernel: tpu_custom_call.1
= control target key start
LH: loop header
LB: loop body
LE: loop exit
PB: predicated region body
PF: predicated region fallthrough
CT: control target
= control target key end

     0   :  { %s3615_s0 = inlined_call_operand.hbm [shape: f32[2,16,128], index: 0, kind: input, shape index: {}]   ;;  %s3616_s1 = inlined_call_operand.hbm [shape: bf16[2,3,128,128], index: 1, kind: input, shape index: {}]   ;;  %s3617_s2 = inlined_call_operand.hbm [shape: bf16[2,3,128,128], index: 2, kind: input, shape index: {}]   ;;  %s3618_s3 = inlined_call_operand.hbm [shape: f32[2,8,128], index: 3, kind: input, shape index: {}]   ;;  %s3619_s4 = inlined_call_operand.vmem [shape: f32[2], index: 4, kind: input, shape index: {}]   ;;  %s3620_s5 = inlined_call_operand.hbm [shape: bf16[128,128], index: 5, kind: input, shape index: {}]   ;;  %s3621_s6 = inlined_call_operand.vmem [shape: f32[1,128], index: 6, kind: input, shape index: {}]   ;;  %s3622_s7 = inlined_call_operand.hbm [shape: f32[2,16,128], index: 7, kind: output, shape index: {}]  }
   0x1   :  { %3630 = sst [smem:[#allocation20_spill]] %s3616_s1 }
   0x2   :  { %12 = vsyncpa [#allocation3], 0 }
   0x3   :  { %14 = vsyncpa [#allocation3 + $0x1], 0 }
   0x4   :  { %15 = vsyncpa [#allocation7], 0 }
   0x5   :  { %16 = vsyncpa [#allocation10], 0 }
   0x6   :  { %17 = vsyncpa [#allocation5], 0 }
   0x7   :  { %18 = vsyncpa [#allocation4], 0 }
   0x8   :  { %20 = vsyncpa [#allocation4 + $0x1], 0  ;;  %s3043_s24 = smov 0   ;;  %s3045_s25 = smov 0  }
   0x9   :  { %s3047_s26 = smov 0   ;;  %s3049_s27 = smov 0  }
   0xa LB: > { %s2988_s28 = smov [#allocation6]   ;;  %s3064_s30 = sadd.s32 4294967295, %s2986_s27   ;;  %s2986_s27 = sphi %s3049_s27, %s3657_s27   ;;  %s2982_s26 = sphi %s3047_s26, %s3656_s26   ;;  %s2978_s25 = sphi %s3045_s25, %s3655_s25   ;;  %s2974_s24 = sphi %s3043_s24, %s3654_s24  }
   0xb   : > { %s221_s29 = sshll.u32 %s2988_s28, 4  ;;  %p2059_p0 = scmp.ge.s32.totalorder %s2986_s27, 1  ;;  %s3069_s29 = int_to_ptr.vmem [resolvable:$true] %s221_s29 }
   0xc   : > { %p3627_p1 = scmp.eq.s32.totalorder %s3064_s30, 0  ;;  %p209_p2 = scmp.lt.s32.totalorder %s2986_s27, 3 }
   0xd   : > { %s2989_s9 = smov [#allocation9]   ;;  %s2990_s12 = smov [#allocation8]  }
   0xe   : > { %p3071_p3 = pnand %p2059_p0, %p209_p2  ;;  %s247_s10 = sshll.u32 %s2989_s9, 4  ;;  %s3084_s10 = int_to_ptr.vmem [resolvable:$true] %s247_s10 }
   0xf   : > { %s3086_s13 = sshll.u32 %s2990_s12, 4  ;;  %s3633_s1 = sld [smem:[#allocation20_spill]]  ;;  %s235_s13 = int_to_ptr.vmem [resolvable:$true] %s3086_s13 }
  0x10   : > { %s3631_s8 = scalar_select %p3071_p3, 1, 0 }
  0x11   : > { %p2554_p5 = pneg %p3071_p3 }
  0x13   : > { %p3080_p6 = pnand %p2554_p5, %p3627_p1 }
  0x15   : > { %s2747_s16 = scalar_lea.hbm %s3633_s1, 6144  ;;  %p3096_p8 = pneg %p3080_p6 }
  0x16   : > { %p2748_p7 = scmp.ne.s32.totalorder %s3633_s1, %s2747_s16  ;;  %p2754_p11 = scmp.lt.u32.totalorder %s2747_s16, %s3633_s1 }
  0x18   : > { %p2750_p9 = pnand %p3096_p8, %p2748_p7 }
  0x1a   : > { %p2751_p10 = pneg %p2750_p9 }
  0x1c   : > { %p2756_p12 = pnand %p2754_p11, %p2751_p10 }
  0x1e   : > { %2759 = shalt.err (!%p2756_p12)
}
  0x1f   : > { %s2760_s22 = scalar_lea.vmem %s3069_s29, 6144  ;;  %p2768_p5 = scmp.lt.s32.totalorder %s3069_s29, %s3069_s29 }
  0x20   : > { %p2761_p13 = scmp.ne.s32.totalorder %s3069_s29, %s2760_s22  ;;  %p2769_p4 = scmp.lt.s32.totalorder %s2760_s22, %s2760_s22 }
  0x22   : > { %p2763_p0 = pnand %p2761_p13, %p3096_p8  ;;  %p2770_p7 = por %p2769_p4, %p2768_p5 }
  0x24   : > { %p2764_p2 = pneg %p2763_p0 }
  0x26   : > { %p2771_p9 = pnand %p2770_p7, %p2764_p2 }
  0x28   : > { %2774 = shalt.err (!%p2771_p9)
}
  0x29   : > { %s3623_s23 = smov 64   ;;  %s3625_s28 = smov 4  }
  0x2a   : > { %2557 = dma.hbm_to_vmem [thread:$0]  (!%p3080_p6), %s3633_s1, 6144, %s3069_s29, [#allocation7], %s3623_s23, %s3623_s23, %s3625_s28  }
  0x2b   : > { %s2775_s16 = scalar_lea.hbm %s3618_s3, 256 }
  0x2c   : > { %p2776_p4 = scmp.ne.s32.totalorder %s3618_s3, %s2775_s16  ;;  %p2782_p12 = scmp.lt.u32.totalorder %s2775_s16, %s3618_s3 }
  0x2e   : > { %p2778_p10 = pnand %p2776_p4, %p3096_p8 }
  0x30   : > { %p2779_p11 = pneg %p2778_p10 }
  0x32   : > { %p2784_p13 = pnand %p2782_p12, %p2779_p11 }
  0x34   : > { %2787 = shalt.err (!%p2784_p13)
}
  0x35   : > { %s2788_s29 = scalar_lea.vmem %s3084_s10, 256  ;;  %p2796_p7 = scmp.lt.s32.totalorder %s3084_s10, %s3084_s10 }
  0x36   : > { %p2789_p0 = scmp.ne.s32.totalorder %s3084_s10, %s2788_s29  ;;  %p2797_p9 = scmp.lt.s32.totalorder %s2788_s29, %s2788_s29 }
  0x38   : > { %p2791_p2 = pnand %p2789_p0, %p3096_p8  ;;  %p2798_p4 = por %p2797_p9, %p2796_p7 }
  0x3a   : > { %p2792_p5 = pneg %p2791_p2 }
  0x3c   : > { %p2799_p10 = pnand %p2798_p4, %p2792_p5 }
  0x3e   : > { %2802 = shalt.err (!%p2799_p10)
}
  0x3f   : > { %s2993_s22 = smov 128   ;;  %s2994_s9 = smov 8  }
  0x40   : > { %2563 = dma.hbm_to_vmem [thread:$0]  (!%p3080_p6), %s3618_s3, 256, %s3084_s10, [#allocation10], %s2993_s22, %s2993_s22, %s2994_s9  }
  0x41   : > { %s261_s17 = sshll.u32 %s3619_s4, 4  ;;  %s2803_s21 = scalar_lea.hbm %s3617_s2, 6144  ;;  %s262_s17 = int_to_ptr.vmem [resolvable:$true] %s261_s17 }
  0x42   : > { %p2804_p11 = scmp.ne.s32.totalorder %s3617_s2, %s2803_s21  ;;  %p2810_p0 = scmp.lt.u32.totalorder %s2803_s21, %s3617_s2 }
  0x44   : > { %p2806_p12 = pnand %p2804_p11, %p3096_p8 }
  0x46   : > { %p2807_p13 = pneg %p2806_p12 }
  0x48   : > { %p2812_p2 = pnand %p2810_p0, %p2807_p13 }
  0x4a   : > { %2815 = shalt.err (!%p2812_p2)
}
  0x4b   : > { %s2816_s10 = scalar_lea.vmem %s235_s13, 6144  ;;  %p2824_p4 = scmp.lt.s32.totalorder %s235_s13, %s235_s13 }
  0x4c   : > { %p2817_p5 = scmp.ne.s32.totalorder %s235_s13, %s2816_s10  ;;  %p2825_p10 = scmp.lt.s32.totalorder %s2816_s10, %s2816_s10 }
  0x4e   : > { %p2819_p7 = pnand %p2817_p5, %p3096_p8  ;;  %p2826_p1 = por %p2825_p10, %p2824_p4 }
  0x50   : > { %p2820_p9 = pneg %p2819_p7 }
  0x52   : > { %p2827_p3 = pnand %p2826_p1, %p2820_p9 }
  0x54   : > { %2830 = shalt.err (!%p2827_p3)
}
  0x55   : > { %s3635_s23 = smov 4   ;;  %s3636_s12 = smov 64  }
  0x56   : > { %2560 = dma.hbm_to_vmem [thread:$0]  (!%p3080_p6), %s3617_s2, 6144, %s235_s13, [#allocation7], %s3636_s12, %s3636_s12, %s3635_s23  }
  0x57   : > { %s2831_s14 = scalar_lea.vmem %s262_s17, 16  ;;  %p2839_p0 = scmp.lt.s32.totalorder %s262_s17, %s262_s17 }
  0x58   : > { %p2832_p11 = scmp.ne.s32.totalorder %s262_s17, %s2831_s14  ;;  %p2840_p2 = scmp.lt.s32.totalorder %s2831_s14, %s2831_s14 }
  0x5a   : > { %p2834_p12 = pnand %p2832_p11, %p3096_p8  ;;  %p2841_p1 = por %p2840_p2, %p2839_p0 }
  0x5c   : > { %p2835_p13 = pneg %p2834_p12 }
  0x5e   : > { %p2842_p3 = pnand %p2841_p1, %p2835_p13 }
  0x60   : > { %2845 = shalt.err (!%p2842_p3)
}
  0x61   : > { %s2995_s15 = smov [#allocation11]   ;;  %s2996_s16 = smov [#allocation12]  }
  0x62   : > { %2566 = dma.vmem_to_smem (!%p3080_p6), %s262_s17, 16, %s2995_s15, [#allocation5]  }
  0x63   : > { %s271_s18 = sshll.u32 %s2996_s16, 4  ;;  %s2846_s21 = scalar_lea.hbm %s3620_s5, 1024  ;;  %s272_s18 = int_to_ptr.vmem [resolvable:$true] %s271_s18 }
  0x64   : > { %p2847_p5 = scmp.ne.s32.totalorder %s3620_s5, %s2846_s21  ;;  %p2853_p4 = scmp.lt.u32.totalorder %s2846_s21, %s3620_s5 }
  0x66   : > { %p2849_p7 = pnand %p2847_p5, %p3096_p8 }
  0x68   : > { %p2850_p9 = pneg %p2849_p7 }
  0x6a   : > { %p2855_p10 = pnand %p2853_p4, %p2850_p9 }
  0x6c   : > { %2858 = shalt.err (!%p2855_p10)
}
  0x6d   : > { %s2859_s17 = scalar_lea.vmem %s272_s18, 1024  ;;  %p2867_p0 = scmp.lt.s32.totalorder %s272_s18, %s272_s18 }
  0x6e   : > { %p2860_p11 = scmp.ne.s32.totalorder %s272_s18, %s2859_s17  ;;  %p2868_p2 = scmp.lt.s32.totalorder %s2859_s17, %s2859_s17 }
  0x70   : > { %p2862_p12 = pnand %p2860_p11, %p3096_p8  ;;  %p2869_p1 = por %p2868_p2, %p2867_p0 }
  0x72   : > { %p2863_p13 = pneg %p2862_p12 }
  0x74   : > { %p2870_p3 = pnand %p2869_p1, %p2863_p13 }
  0x76   : > { %2873 = shalt.err (!%p2870_p3)
}
  0x77   : > { %2569 = dma.hbm_to_vmem [thread:$0]  (!%p3080_p6), %s3620_s5, 1024, %s272_s18, [#allocation10], %s3636_s12, %s3636_s12, %s3635_s23  }
  0x78   : > { %s2058_s11 = sadd.s32 4294967294, %s2986_s27   ;;  %s3198_s19 = sadd.s32 1, %s2986_s27  }
  0x79   : > { %s33_s16 = sadd.s32 1, %s2982_s26  ;;  %s30_s13 = ssub.s32 %s2986_s27, %s3198_s19 }
  0x7a   : > { %p40_p8 = scmp.ne.s32.totalorder %s2982_s26, %s2978_s25  ;;  %p31_p5 = scmp.eq.s32.totalorder %s30_s13, 0 }
  0x7b   : > { %p41_p7 = scmp.eq.s32.totalorder %s2986_s27, 0  ;;  %p46_p9 = scmp.ne.s32.totalorder %s2978_s25, %s2974_s24 }
  0x7c   : > { %p196_p4 = scmp.eq.s32.totalorder %s3064_s30, 1  ;;  %p3637_p11 = scmp.eq.s32.totalorder %s3064_s30, 0 }
  0x7d   : > { %s3210_s20 = scalar_select %p31_p5, %s2982_s26, %s33_s16  }
  0x7e   : > { %p42_p10 = por %p41_p7, %p40_p8  ;;  %p3214_p12 = por %p3637_p11, %p46_p9 }
  0x7f   : > { %p3218_p6 = por %p196_p4, %p40_p8  ;;  %p202_p13 = scmp.eq.s32.totalorder %s2058_s11, 1 }
  0x80   : > { %p2583_p0 = scmp.lt.s32.totalorder %s2986_s27, 2  ;;  %s288_s12 = sand.u32 1, %s2982_s26  }
  0x81   : > { %s3639_s23 = scalar_select %p3218_p6, 1, 0 }
  0x82   : > { %p3224_p2 = por %p202_p13, %p46_p9  ;;  %s2066_s29 = sshll.u32 %s288_s12, 4 }
  0x83   : > { %s2180_s10 = sshll.u32 %s2986_s27, 8  ;;  %s292_s14 = scalar_lea.vmem [#allocation2], %s2066_s29 }
  0x84   : > { %s3640_s18 = scalar_select %p3224_p2, 1, 0 }
  0x85   : > { %s3232_s17 = scalar_lea.hbm %s3615_s0, %s2180_s10  ;;  %s299_s15 = sshll.u32 %s292_s14, 4  ;;  %s3238_s15 = int_to_ptr.vmem [resolvable:$true] %s299_s15 }
  0x86   : > { %p3234_p1 = pnand %p2583_p0, %p42_p10  ;;  %s3240_s16 = scalar_lea.sflag [#allocation3], %s288_s12 }
  0x87   : > { %s2874_s13 = scalar_lea.hbm %s3232_s17, 256  ;;  %s2879_s1 = scalar_lea.hbm %s3615_s0, 512 }
  0x88   : > { %p2875_p3 = scmp.ne.s32.totalorder %s3232_s17, %s2874_s13  ;;  %p2876_p8 = pneg %p3234_p1 }
  0x89   : > { %p2880_p9 = scmp.lt.u32.totalorder %s3232_s17, %s3615_s0  ;;  %p2881_p4 = scmp.lt.u32.totalorder %s2879_s1, %s2874_s13 }
  0x8a   : > { %p2877_p5 = pnand %p2876_p8, %p2875_p3  ;;  %p2883_p11 = scmp.lt.u32.totalorder %s2874_s13, %s3232_s17 }
  0x8b   : > { %p2882_p10 = por %p2881_p4, %p2880_p9 }
  0x8c   : > { %p2878_p7 = pneg %p2877_p5 }
  0x8d   : > { %p2884_p13 = por %p2883_p11, %p2882_p10 }
  0x8f   : > { %p2885_p0 = pnand %p2884_p13, %p2878_p7 }
  0x91   : > { %2888 = shalt.err (!%p2885_p0)
}
  0x92   : > { %s2889_s12 = scalar_lea.vmem %s3238_s15, 256  ;;  %s2997_s29 = smov [#allocation2]  }
  0x93   : > { %p2890_p3 = scmp.ne.s32.totalorder %s3238_s15, %s2889_s12  ;;  %s2894_s10 = sshll.u32 %s2997_s29, 4  ;;  %s2895_s10 = int_to_ptr.vmem [resolvable:$false] %s2894_s10 }
  0x94   : > { %s2896_s28 = scalar_lea.vmem %s2895_s10, 512  ;;  %p2897_p6 = scmp.lt.s32.totalorder %s3238_s15, %s2895_s10 }
  0x95   : > { %p2892_p5 = pnand %p2890_p3, %p2876_p8  ;;  %p2898_p9 = scmp.lt.s32.totalorder %s2896_s28, %s2889_s12 }
  0x97   : > { %p2893_p2 = pneg %p2892_p5  ;;  %p2899_p4 = por %p2898_p9, %p2897_p6 }
  0x99   : > { %p2900_p10 = pnand %p2899_p4, %p2893_p2 }
  0x9b   : > { %2903 = shalt.err (!%p2900_p10)
}
  0x9c   : > { %2573 = dma.hbm_to_vmem [thread:$0]  (!%p3234_p1), %s3232_s17, 256, %s3238_s15, %s3240_s16, %s2993_s22, %s2993_s22, %s2994_s9  }
  0x9d   : > { %p3642_p8 = scmp.ne.s32.totalorder %s3631_s8, 0 }
  0x9e   : > { %s3274_s13 = sand.u32 (!%p3642_p8), 1, %s2978_s25  }
  0x9f   : > { %311 = sbr.rel (%p3642_p8) target bundleno = 2131 (0x853), region = 48  ;;  %s2070_s1 = sshll.u32 (!%p3642_p8), %s3274_s13, 4 }
  0xa0   : > { %s314_s14 = scalar_lea.sflag (!%p3642_p8), [#allocation3], %s3274_s13  ;;  %s3280_s11 = scalar_lea.vmem (!%p3642_p8), [#allocation2], %s2070_s1 }
  0xa6   : > { %2949 = dma.done.wait (%p3214_p12), %s314_s14, 256  }
  0xa7   : > { %2951 = vsyncadd (%p3214_p12), %s314_s14, 4294967040  ;;  %p3643_p6 = scmp.eq.s32.totalorder %s3064_s30, 0 }
  0xa9   : > { %2953 = dma.done.wait (%p3643_p6), [#allocation7], 12288   ;;  %p3644_p2 = pmov %p3643_p6 }
  0xab   : > { %2955 = vsyncadd (%p3644_p2), [#allocation7], 4294955008  ;;  %p3645_p1 = pmov %p3644_p2 }
  0xad   : > { %2957 = dma.done.wait (%p3645_p1), [#allocation10], 256   ;;  %p3646_p7 = pmov %p3645_p1 }
  0xae   : > { %p3647_p11 = pmov %p3645_p1 }
  0xaf   : > { %2959 = vsyncadd (%p3646_p7), [#allocation10], 4294967040 }
  0xb0   : > { %2961 = dma.done.wait (%p3647_p11), [#allocation5], 16   ;;  %p3648_p13 = pmov %p3645_p1 }
  0xb1   : > { %p3649_p12 = pmov %p3645_p1 }
  0xb2   : > { %2963 = vsyncadd (%p3648_p13), [#allocation5], 4294967280 }
  0xb3   : > { %2965 = dma.done.wait (%p3649_p12), [#allocation10], 1024   ;;  %p3650_p0 = pmov %p3645_p1 }
  0xb5   : > { %2967 = vsyncadd (%p3650_p0), [#allocation10], 4294966272 }
  0xb6   : > { %342 = sfence }
  0xb7   : > { %v2635_v0 = vld [vmem:[#allocation6 + $0x80] sm:$0xff]   ;;  %v2998_v1 = vmov 0.0   ;;  %v2637_v3 = vld [vmem:[#allocation6 + $0x88] sm:$0xff]   ;;  %vm2999_vm0 = vmmov 0   ;;  %v2639_v5 = vld [vmem:[#allocation6 + $0x90] sm:$0xff]   ;;  %v372_v28 = vlaneseq  ;;  %s1145_s8 = sld [smem:[#allocation11]] }
  0xb8   : > { %2290 = vmatprep.subr.bf16.mxu0 %v2998_v1  ;;  %2310 = vmatprep.subr.bf16.mxu1 %v2998_v1  ;;  %v2636_v2 = vld [vmem:[#allocation6] sm:$0xff]   ;;  %v2638_v4 = vld [vmem:[#allocation6 + $0x8] sm:$0xff]   ;;  %v2640_v6 = vld [vmem:[#allocation6 + $0x10] sm:$0xff]   ;;  %s2165_s22 = sld [smem:[#allocation11 + $0x1]]  ;;  %s368_s17 = scalar_lea.vmem [#allocation13], %s2070_s1 }
  0xb9   : > { %2291 = vmatpush3.bf16.msra.mxu0 %v2635_v0  ;;  %2306 = vmatprep.mubr.msk.bf16.mxu0 %vm2999_vm0, %v2998_v1  ;;  %v2641_v7 = vld [vmem:[#allocation6 + $0x98] sm:$0xff]   ;;  %v2643_v9 = vld [vmem:[#allocation6 + $0xa0] sm:$0xff]   ;;  %v2645_v11 = vld [vmem:[#allocation6 + $0xa8] sm:$0xff]   ;;  %v3346_v29 = vshrl.u32 %v372_v28, 7  ;;  %s1931_s15 = sshll.u32 %s368_s17, 4  ;;  %s2181_s16 = sshll.u32 %s3064_s30, 8  ;;  %s3566_s15 = int_to_ptr.vmem [resolvable:$true] %s1931_s15 }
  0xba   : > { %2311 = vmatpush3.bf16.msra.mxu1 %v2636_v2  ;;  %2292 = vmatprep.subr.bf16.mxu0 %v2998_v1  ;;  %v2642_v8 = vld [vmem:[#allocation6 + $0x18] sm:$0xff]   ;;  %v2644_v10 = vld [vmem:[#allocation6 + $0x20] sm:$0xff]   ;;  %v2646_v12 = vld [vmem:[#allocation6 + $0x28] sm:$0xff]   ;;  %s3571_s10 = scalar_lea.hbm %s3622_s7, %s2181_s16  ;;  %s1918_s28 = scalar_lea.sflag [#allocation4], %s3274_s13 }
  0xbb   : > { %2312 = vmatprep.subr.bf16.mxu1 %v2998_v1  ;;  %2326 = vmatprep.mubr.msk.bf16.mxu1 %vm2999_vm0, %v2998_v1  ;;  %v2647_v13 = vld [vmem:[#allocation6 + $0xb0] sm:$0xff]   ;;  %v2649_v15 = vld [vmem:[#allocation6 + $0xb8] sm:$0xff]   ;;  %v2651_v19 = vld [vmem:[#allocation6 + $0x40] sm:$0xff]   ;;  %v396_v30 = vsub.s32 0, %v3346_v29  ;;  %vm594_vm1 = vcmp.lt.s32.totalorder %v3346_v29, 2  ;;  %vm597_vm2 = vcmp.ge.s32.totalorder %v3346_v29, 2 }
  0xbc   : > { %v2648_v14 = vld [vmem:[#allocation6 + $0x30] sm:$0xff]   ;;  %v3324_v17 = vld [vmem:[%s3280_s11 + $0x8] sm:$0xff]  ;;  %v2655_v24 = vld [vmem:[#allocation6 + $0x60] sm:$0xff]   ;;  %vm711_vm3 = vcmp.lt.s32.totalorder %v3346_v29, 1  ;;  %vm714_vm4 = vcmp.ge.s32.totalorder %v3346_v29, 1  ;;  %vm980_vm5 = vcmp.lt.s32.totalorder %v3346_v29, 4 }
  0xbd   : > { %2293 = vmatpush3.bf16.msra.mxu0 %v2637_v3  ;;  %v3321_v16 = vld [vmem:[%s3280_s11] sm:$0xff]  ;;  %v2650_v18 = vld [vmem:[#allocation6 + $0x38] sm:$0xff]   ;;  %v2652_v21 = vld [vmem:[#allocation6 + $0x48] sm:$0xff]   ;;  %vm983_vm6 = vcmp.ge.s32.totalorder %v3346_v29, 4  ;;  %s2904_s30 = scalar_lea.vmem %s3566_s15, 256  ;;  %p3651_p5 = scmp.ne.s32.totalorder %s3639_s23, 0 }
  0xbe   : > { %2313 = vmatpush3.bf16.msra.mxu1 %v2638_v4  ;;  %2294 = vmatprep.subr.bf16.mxu0 %v2998_v1  ;;  %v376_v20 = vpack.c.bf16 %v3324_v17, %v3321_v16  ;;  %v2653_v22 = vld [vmem:[#allocation6 + $0x50] sm:$0xff]   ;;  %v2654_v23 = vld [vmem:[#allocation6 + $0x58] sm:$0xff]   ;;  %v2656_v25 = vld [vmem:[#allocation6 + $0x68] sm:$0xff]   ;;  %p2905_p3 = scmp.ne.s32.totalorder %s3566_s15, %s2904_s30  ;;  %s3000_s1 = smov [#allocation13]  }
  0xbf   : > { %2314 = vmatprep.subr.bf16.mxu1 %v2998_v1  ;;  %v2657_v26 = vld [vmem:[#allocation6 + $0x70] sm:$0xff]   ;;  %v2658_v27 = vld [vmem:[#allocation6 + $0x78] sm:$0xff]   ;;  %v3349_v31 = vld [vmem:[#allocation9] sm:$0xff]  ;;  %s2908_s14 = sshll.u32 %s3000_s1, 4  ;;  %s2909_s14 = int_to_ptr.vmem [resolvable:$false] %s2908_s14 }
  0xc0   : > { %v397_v32 = vrot.slane %v3349_v31, %v396_v30  ;;  %v2659_v63 = vld [vmem:[#allocation8 + $0x80] sm:$0xff]   ;;  %v2661_v2 = vld [vmem:[#allocation8 + $0x88] sm:$0xff]   ;;  %v2663_v4 = vld [vmem:[#allocation8 + $0x90] sm:$0xff]   ;;  %p2906_p9 = pnand %p2905_p3, %p3651_p5  ;;  %s2910_s11 = scalar_lea.vmem %s2909_s14, 512 }
  0xc1   : > { %2295 = vmatpush3.bf16.msra.mxu0 %v2639_v5  ;;  %v2660_v0 = vld [vmem:[#allocation8] sm:$0xff]   ;;  %v2662_v3 = vld [vmem:[#allocation8 + $0x8] sm:$0xff]   ;;  %v2664_v5 = vld [vmem:[#allocation8 + $0x10] sm:$0xff]   ;;  %p2911_p10 = scmp.lt.s32.totalorder %s3566_s15, %s2909_s14  ;;  %p2912_p8 = scmp.lt.s32.totalorder %s2910_s11, %s2904_s30 }
  0xc2   : > { %2315 = vmatpush3.bf16.msra.mxu1 %v2640_v6  ;;  %2296 = vmatprep.subr.bf16.mxu0 %v2998_v1  ;;  %v2665_v6 = vld [vmem:[#allocation8 + $0x98] sm:$0xff]   ;;  %p2907_p4 = pneg %p2906_p9 }
  0xc3   : > { %2316 = vmatprep.subr.bf16.mxu1 %v2998_v1  ;;  %p2913_p6 = por %p2912_p8, %p2911_p10 }
  0xc5   : > { %2297 = vmatpush3.bf16.msra.mxu0 %v2641_v7  ;;  %v2666_v7 = vld [vmem:[#allocation8 + $0x18] sm:$0xff]   ;;  %p2914_p2 = pnand %p2913_p6, %p2907_p4 }
  0xc6   : > { %2317 = vmatpush3.bf16.msra.mxu1 %v2642_v8  ;;  %2298 = vmatprep.subr.bf16.mxu0 %v2998_v1  ;;  %v2667_v8 = vld [vmem:[#allocation8 + $0xa0] sm:$0xff]  }
  0xc7   : > { %2318 = vmatprep.subr.bf16.mxu1 %v2998_v1 }
  0xc9   : > { %2299 = vmatpush3.bf16.msra.mxu0 %v2643_v9  ;;  %v2668_v9 = vld [vmem:[#allocation8 + $0x20] sm:$0xff]  }
  0xca   : > { %2319 = vmatpush3.bf16.msra.mxu1 %v2644_v10  ;;  %2300 = vmatprep.subr.bf16.mxu0 %v2998_v1  ;;  %v2669_v10 = vld [vmem:[#allocation8 + $0xa8] sm:$0xff]  }
  0xcb   : > { %2320 = vmatprep.subr.bf16.mxu1 %v2998_v1 }
  0xcd   : > { %2301 = vmatpush3.bf16.msra.mxu0 %v2645_v11  ;;  %v2670_v11 = vld [vmem:[#allocation8 + $0x28] sm:$0xff]  }
  0xce   : > { %2321 = vmatpush3.bf16.msra.mxu1 %v2646_v12  ;;  %2302 = vmatprep.subr.bf16.mxu0 %v2998_v1  ;;  %v2671_v12 = vld [vmem:[#allocation8 + $0xb0] sm:$0xff]  }
  0xcf   : > { %2322 = vmatprep.subr.bf16.mxu1 %v2998_v1 }
  0xd1   : > { %2303 = vmatpush3.bf16.msra.mxu0 %v2647_v13  ;;  %v2672_v13 = vld [vmem:[#allocation8 + $0x30] sm:$0xff]  }
  0xd2   : > { %2323 = vmatpush3.bf16.msra.mxu1 %v2648_v14  ;;  %2304 = vmatprep.subr.bf16.mxu0 %v2998_v1  ;;  %v2673_v14 = vld [vmem:[#allocation8 + $0xb8] sm:$0xff]  }
  0xd3   : > { %2324 = vmatprep.subr.bf16.mxu1 %v2998_v1 }
  0xd5   : > { %2305 = vmatpush3.bf16.msra.mxu0 %v2649_v15  ;;  %v2674_v15 = vld [vmem:[#allocation8 + $0x38] sm:$0xff]  }
  0xd6   : > { %2325 = vmatpush3.bf16.msra.mxu1 %v2650_v18  ;;  %2330 = vmatprep.subr.bf16.mxu0 %v2998_v1 }
  0xd7   : > { %2350 = vmatprep.subr.bf16.mxu1 %v2998_v1 }
  0xd8   : > { %2307 = vmatmul.mubr.bf16.vlgmr.msra.gmra.mrb[0].mxu0 %v376_v20 }
  0xd9   : > { %2327 = vmatmul.mubr.bf16.vlgmr.msra.gmra.mrb[0].mxu1 %v376_v20  ;;  %2331 = vmatpush3.bf16.msra.mxu0 %v2651_v19 }
  0xda   : > { %2332 = vmatprep.subr.bf16.mxu0 %v2998_v1  ;;  %2346 = vmatprep.mubr.msk.bf16.mxu0 %vm2999_vm0, %v2998_v1 }
  0xdb   : > { %2366 = vmatprep.mubr.msk.bf16.mxu1 %vm2999_vm0, %v2998_v1  ;;  %2351 = vmatpush3.bf16.msra.mxu1 %v2659_v63 }
  0xdc   : > { %2352 = vmatprep.subr.bf16.mxu1 %v2998_v1 }
  0xdd   : > { %2333 = vmatpush3.bf16.msra.mxu0 %v2652_v21 }
  0xde   : > { %2334 = vmatprep.subr.bf16.mxu0 %v2998_v1 }
  0xdf   : > { %2353 = vmatpush3.bf16.msra.mxu1 %v2661_v2 }
  0xe0   : > { %2354 = vmatprep.subr.bf16.mxu1 %v2998_v1 }
  0xe1   : > { %2335 = vmatpush3.bf16.msra.mxu0 %v2653_v22 }
  0xe2   : > { %2336 = vmatprep.subr.bf16.mxu0 %v2998_v1 }
  0xe3   : > { %2355 = vmatpush3.bf16.msra.mxu1 %v2663_v4 }
  0xe4   : > { %2356 = vmatprep.subr.bf16.mxu1 %v2998_v1 }
  0xe5   : > { %2337 = vmatpush3.bf16.msra.mxu0 %v2654_v23 }
  0xe6   : > { %2338 = vmatprep.subr.bf16.mxu0 %v2998_v1 }
  0xe7   : > { %2357 = vmatpush3.bf16.msra.mxu1 %v2665_v6 }
  0xe8   : > { %2358 = vmatprep.subr.bf16.mxu1 %v2998_v1 }
  0xe9   : > { %2339 = vmatpush3.bf16.msra.mxu0 %v2655_v24 }
  0xea   : > { %2340 = vmatprep.subr.bf16.mxu0 %v2998_v1 }
  0xeb   : > { %2359 = vmatpush3.bf16.msra.mxu1 %v2667_v8 }
  0xec   : > { %2360 = vmatprep.subr.bf16.mxu1 %v2998_v1 }
  0xed   : > { %2341 = vmatpush3.bf16.msra.mxu0 %v2656_v25 }
  0xee   : > { %2342 = vmatprep.subr.bf16.mxu0 %v2998_v1 }
  0xef   : > { %2361 = vmatpush3.bf16.msra.mxu1 %v2669_v10 }
  0xf0   : > { %2362 = vmatprep.subr.bf16.mxu1 %v2998_v1 }
  0xf1   : > { %2343 = vmatpush3.bf16.msra.mxu0 %v2657_v26 }
  0xf2   : > { %2344 = vmatprep.subr.bf16.mxu0 %v2998_v1 }
  0xf3   : > { %2363 = vmatpush3.bf16.msra.mxu1 %v2671_v12 }
  0xf4   : > { %2364 = vmatprep.subr.bf16.mxu1 %v2998_v1 }
  0xf5   : > { %2345 = vmatpush3.bf16.msra.mxu0 %v2658_v27 }
  0xf6   : > { %2370 = vmatprep.subr.bf16.mxu0 %v2998_v1 }
  0xf7   : > { %2365 = vmatpush3.bf16.msra.mxu1 %v2673_v14 }
  0xf8   : > { %2347 = vmatmul.mubr.bf16.vlgmr.msra.gmra.mrb[4].mxu0 %v376_v20  ;;  %2390 = vmatprep.subr.bf16.mxu1 %v2998_v1 }
  0xf9   : > { %2386 = vmatprep.mubr.msk.bf16.mxu0 %vm2999_vm0, %v2998_v1  ;;  %2371 = vmatpush3.bf16.msra.mxu0 %v2660_v0 }
  0xfa   : > { %2372 = vmatprep.subr.bf16.mxu0 %v2998_v1 }
  0xfd   : > { %2373 = vmatpush3.bf16.msra.mxu0 %v2662_v3 }
  0xfe   : > { %2374 = vmatprep.subr.bf16.mxu0 %v2998_v1 }
 0x101   : > { %2375 = vmatpush3.bf16.msra.mxu0 %v2664_v5 }
 0x102   : > { %2376 = vmatprep.subr.bf16.mxu0 %v2998_v1 }
 0x105   : > { %2377 = vmatpush3.bf16.msra.mxu0 %v2666_v7 }
 0x106   : > { %2378 = vmatprep.subr.bf16.mxu0 %v2998_v1 }
 0x109   : > { %2379 = vmatpush3.bf16.msra.mxu0 %v2668_v9 }
 0x10a   : > { %2380 = vmatprep.subr.bf16.mxu0 %v2998_v1 }
 0x10d   : > { %2381 = vmatpush3.bf16.msra.mxu0 %v2670_v11 }
 0x10e   : > { %2382 = vmatprep.subr.bf16.mxu0 %v2998_v1 }
 0x111   : > { %2383 = vmatpush3.bf16.msra.mxu0 %v2672_v13 }
 0x112   : > { %2384 = vmatprep.subr.bf16.mxu0 %v2998_v1 }
 0x115   : > { %2385 = vmatpush3.bf16.msra.mxu0 %v2674_v15 }
 0x116   : > { %2410 = vmatprep.subr.bf16.mxu0 %v2998_v1 }
 0x1ab   : > { %v480_v33 = vpop.f32.mrb[0].mxu0 }
 0x1ac   : > { %v585_v34 = vpop.f32.mrb[0].mxu1  ;;  %v2308_v35 = vpop.f32.mrb[1].mxu0  ;;  %v481_v44 = vadd.f32 %v480_v33, %v397_v32 }
 0x1ad   : > { %v592_v36 = vrot.slane %v585_v34, 6  ;;  %v2328_v37 = vpop.f32.mrb[1].mxu1  ;;  %v483_v38 = vpop.f32.mrb[2].mxu0 }
 0x1ae   : > { %v484_v39 = vadd.f32 %v483_v38, %v397_v32  ;;  %v588_v40 = vpop.f32.mrb[2].mxu1  ;;  %v2309_v41 = vpop.f32.mrb[3].mxu0  ;;  %v746_v37 = vsub.s32 1, %v3346_v29 }
 0x1af   : > { %v593_v42 = vrot.slane %v588_v40, 6  ;;  %v2329_v43 = vpop.f32.mrb[3].mxu1 }
 0x1b0   : > { %v747_v38 = vrot.slane %v3349_v31, %v746_v37 }
 0x1b1   : > { %v595_v45 = vsel %vm594_vm1, %v592_v36, %v593_v42  ;;  %v596_v46 = vsel %vm594_vm1, %v593_v42, %v592_v36 }
 0x1b2   : > { %v599_v47 = vsel %vm597_vm2, %v596_v46, 0.0  ;;  %v602_v48 = vadd.f32 %v595_v45, %v484_v39  ;;  %v756_v39 = vsub.s32 2, %v3346_v29 }
 0x1b3   : > { %v601_v49 = vadd.f32 %v599_v47, %v481_v44 }
 0x1b4   : > { %v757_v44 = vrot.slane %v3349_v31, %v756_v39 }
 0x1cb   : > { %v702_v50 = vpop.f32.mrb[4].mxu0 }
 0x1cc   : > { %v2348_v51 = vpop.f32.mrb[5].mxu0  ;;  %v709_v53 = vrot.slane %v702_v50, 7 }
 0x1cd   : > { %v705_v52 = vpop.f32.mrb[6].mxu0 }
 0x1ce   : > { %v710_v54 = vrot.slane %v705_v52, 7  ;;  %v2349_v55 = vpop.f32.mrb[7].mxu0 }
 0x1cf   : > { %v2676_v55 = vld [vmem:[#allocation8 + $0x48] sm:$0xff]  }
 0x1d0   : > { %v713_v56 = vsel %vm711_vm3, %v710_v54, %v709_v53  ;;  %v712_v57 = vsel %vm711_vm3, %v709_v53, %v710_v54  ;;  %v2675_v53 = vld [vmem:[#allocation8 + $0x40] sm:$0xff]  }
 0x1d1   : > { %v716_v58 = vsel %vm714_vm4, %v713_v56, 0.0  ;;  %v3364_v59 = vadd.f32 %v712_v57, %v602_v48  ;;  %v2677_v56 = vld [vmem:[#allocation8 + $0x50] sm:$0xff]   ;;  %v2678_v57 = vld [vmem:[#allocation8 + $0x58] sm:$0xff]  }
 0x1d2   : > { %v3366_v60 = vadd.f32 %v716_v58, %v601_v49  ;;  %v2679_v58 = vld [vmem:[#allocation8 + $0x60] sm:$0xff]  }
 0x1d3   : > { %v727_v62 = vmul.f32 %v3364_v59, %v3364_v59 }
 0x1d4   : > { %720 = vadd.xlane.f32.xlu0 %v3366_v60  ;;  %v726_v61 = vmul.f32 %v3366_v60, %v3366_v60 }
 0x1d6   : > { %728 = vadd.xlane.f32.xlu1 %v726_v61  ;;  %v2682_v61 = vld [vmem:[#allocation8 + $0x78] sm:$0xff]  }
 0x1d8   : > { %722 = vadd.xlane.f32.xlu0 %v3364_v59 }
 0x1da   : > { %730 = vadd.xlane.f32.xlu1 %v727_v62  ;;  %v782_v62 = vsub.s32 3, %v3346_v29 }
 0x1dc   : > { %v783_v2 = vrot.slane %v3349_v31, %v782_v62 }
 0x261   : > { %v721_v18 = vpop.xlane.xlu0 %720 }
 0x262   : > { %v724_v19 = vmul.f32 0.03125, %v721_v18 }
 0x263   : > { %v729_v20 = vpop.xlane.xlu1 %728 }
 0x264   : > { %v734_v21 = vmul.f32 %v724_v19, %v724_v19  ;;  %v732_v22 = vmul.f32 0.03125, %v729_v20  ;;  %v750_v41 = vsub.f32 %v3366_v60, %v724_v19  ;;  %v2681_v60 = vld [vmem:[#allocation8 + $0x70] sm:$0xff]  }
 0x265   : > { %v723_v23 = vpop.xlane.xlu0 %722 }
 0x266   : > { %v736_v24 = vsub.f32 %v732_v22, %v734_v21  ;;  %v725_v25 = vmul.f32 0.03125, %v723_v23 }
 0x267   : > { %v731_v26 = vpop.xlane.xlu1 %730 }
 0x268   : > { %v738_v27 = vmax.f32 %v736_v24, 0.0  ;;  %v735_v28 = vmul.f32 %v725_v25, %v725_v25  ;;  %v733_v32 = vmul.f32 0.03125, %v731_v26  ;;  %v751_v46 = vsub.f32 %v3364_v59, %v725_v25  ;;  %v2680_v59 = vld [vmem:[#allocation8 + $0x68] sm:$0xff]  }
 0x26a   : > { %v740_v33 = vadd.f32 1e-08, %v738_v27  ;;  %v737_v34 = vsub.f32 %v733_v32, %v735_v28 }
 0x26c   : > { %2731 = vrsqrt.f32 %v740_v33  ;;  %v739_v35 = vmax.f32 %v737_v34, 0.0 }
 0x26e   : > { %v741_v36 = vadd.f32 1e-08, %v739_v35 }
 0x270   : > { %2733 = vrsqrt.f32 %v741_v36  ;;  %v2683_v36 = vld [vmem:[#allocation6 + $0x140] sm:$0xff]  }
 0x276   : > { %v2732_v40 = vpop.eup %2731 }
 0x277   : > { %v748_v42 = vmul.f32 %v2732_v40, %v747_v38  ;;  %v2685_v40 = vld [vmem:[#allocation6 + $0x148] sm:$0xff]  }
 0x279   : > { %v752_v43 = vmul.f32 %v750_v41, %v748_v42  ;;  %v2686_v41 = vld [vmem:[#allocation6 + $0xc8] sm:$0xff]   ;;  %v2687_v42 = vld [vmem:[#allocation6 + $0x150] sm:$0xff]  }
 0x27a   : > { %v2734_v45 = vpop.eup %2733 }
 0x27b   : > { %v749_v47 = vmul.f32 %v2734_v45, %v747_v38  ;;  %v758_v49 = vadd.f32 %v757_v44, %v752_v43  ;;  %v2684_v38 = vld [vmem:[#allocation6 + $0xc0] sm:$0xff]   ;;  %v2688_v43 = vld [vmem:[#allocation6 + $0xd0] sm:$0xff]   ;;  %v2690_v45 = vld [vmem:[#allocation6 + $0xd8] sm:$0xff]  }
 0x27d   : > { %v753_v48 = vmul.f32 %v751_v46, %v749_v47  ;;  %v760_v51 = vmax.f32 %v758_v49, 0.0  ;;  %v2691_v46 = vld [vmem:[#allocation6 + $0x160] sm:$0xff]   ;;  %v2694_v49 = vld [vmem:[#allocation6 + $0xe8] sm:$0xff]  }
 0x27e   : > { %v2692_v47 = vld [vmem:[#allocation6 + $0xe0] sm:$0xff]  }
 0x27f   : > { %v759_v50 = vadd.f32 %v757_v44, %v753_v48  ;;  %v2689_v44 = vld [vmem:[#allocation6 + $0x158] sm:$0xff]   ;;  %v2693_v48 = vld [vmem:[#allocation6 + $0x168] sm:$0xff]  }
 0x281   : > { %v761_v52 = vmax.f32 %v759_v50, 0.0  ;;  %v2695_v50 = vld [vmem:[#allocation6 + $0x170] sm:$0xff]  }
 0x283   : > { %v762_v54 = vpack.c.bf16 %v761_v52, %v760_v51  ;;  %v2696_v51 = vld [vmem:[#allocation6 + $0xf0] sm:$0xff]   ;;  %v2697_v52 = vld [vmem:[#allocation6 + $0x178] sm:$0xff]  }
 0x285   : > { %2367 = vmatmul.mubr.bf16.vlgmr.msra.gmra.mrb[4].mxu1 %v762_v54  ;;  %2387 = vmatmul.mubr.bf16.vlgmr.msra.gmra.mrb[8].mxu0 %v762_v54 }
 0x286   : > { %2391 = vmatpush3.bf16.msra.mxu1 %v2675_v53  ;;  %2406 = vmatprep.mubr.msk.bf16.mxu1 %vm2999_vm0, %v2998_v1  ;;  %v2698_v53 = vld [vmem:[#allocation6 + $0xf8] sm:$0xff]  }
 0x287   : > { %2392 = vmatprep.subr.bf16.mxu1 %v2998_v1  ;;  %2426 = vmatprep.mubr.msk.bf16.mxu0 %vm2999_vm0, %v2998_v1 }
 0x288   : > { %2411 = vmatpush3.bf16.msra.mxu0 %v2683_v36  ;;  %v2703_v36 = vld [vmem:[#allocation6 + $0x120] sm:$0xff]  }
 0x289   : > { %2412 = vmatprep.subr.bf16.mxu0 %v2998_v1 }
 0x28a   : > { %2393 = vmatpush3.bf16.msra.mxu1 %v2676_v55 }
 0x28b   : > { %2394 = vmatprep.subr.bf16.mxu1 %v2998_v1 }
 0x28c   : > { %2413 = vmatpush3.bf16.msra.mxu0 %v2685_v40  ;;  %v2705_v40 = vld [vmem:[#allocation6 + $0x130] sm:$0xff]  }
 0x28d   : > { %2414 = vmatprep.subr.bf16.mxu0 %v2998_v1 }
 0x28e   : > { %2395 = vmatpush3.bf16.msra.mxu1 %v2677_v56 }
 0x28f   : > { %2396 = vmatprep.subr.bf16.mxu1 %v2998_v1 }
 0x290   : > { %2415 = vmatpush3.bf16.msra.mxu0 %v2687_v42  ;;  %v3490_v42 = vld [vmem:[#allocation9 + $0x8] sm:$0xff] }
 0x291   : > { %2416 = vmatprep.subr.bf16.mxu0 %v2998_v1 }
 0x292   : > { %2397 = vmatpush3.bf16.msra.mxu1 %v2678_v57 }
 0x293   : > { %2398 = vmatprep.subr.bf16.mxu1 %v2998_v1 }
 0x294   : > { %2417 = vmatpush3.bf16.msra.mxu0 %v2689_v44 }
 0x295   : > { %2418 = vmatprep.subr.bf16.mxu0 %v2998_v1 }
 0x296   : > { %2399 = vmatpush3.bf16.msra.mxu1 %v2679_v58 }
 0x297   : > { %2400 = vmatprep.subr.bf16.mxu1 %v2998_v1 }
 0x298   : > { %2419 = vmatpush3.bf16.msra.mxu0 %v2691_v46 }
 0x299   : > { %2420 = vmatprep.subr.bf16.mxu0 %v2998_v1 }
 0x29a   : > { %2401 = vmatpush3.bf16.msra.mxu1 %v2680_v59 }
 0x29b   : > { %2402 = vmatprep.subr.bf16.mxu1 %v2998_v1 }
 0x29c   : > { %2421 = vmatpush3.bf16.msra.mxu0 %v2693_v48 }
 0x29d   : > { %2422 = vmatprep.subr.bf16.mxu0 %v2998_v1 }
 0x29e   : > { %2403 = vmatpush3.bf16.msra.mxu1 %v2681_v60 }
 0x29f   : > { %2404 = vmatprep.subr.bf16.mxu1 %v2998_v1 }
 0x2a0   : > { %2423 = vmatpush3.bf16.msra.mxu0 %v2695_v50 }
 0x2a1   : > { %2424 = vmatprep.subr.bf16.mxu0 %v2998_v1 }
 0x2a2   : > { %2405 = vmatpush3.bf16.msra.mxu1 %v2682_v61 }
 0x2a3   : > { %2430 = vmatprep.subr.bf16.mxu1 %v2998_v1 }
 0x2a4   : > { %2425 = vmatpush3.bf16.msra.mxu0 %v2697_v52 }
 0x2a5   : > { %2407 = vmatmul.mubr.bf16.vlgmr.msra.gmra.mrb[8].mxu1 %v762_v54  ;;  %2450 = vmatprep.subr.bf16.mxu0 %v2998_v1 }
 0x2a6   : > { %2446 = vmatprep.mubr.msk.bf16.mxu1 %vm2999_vm0, %v2998_v1  ;;  %2431 = vmatpush3.bf16.msra.mxu1 %v2684_v38  ;;  %v2704_v38 = vld [vmem:[#allocation6 + $0x128] sm:$0xff]  }
 0x2a7   : > { %2432 = vmatprep.subr.bf16.mxu1 %v2998_v1 }
 0x2aa   : > { %2433 = vmatpush3.bf16.msra.mxu1 %v2686_v41  ;;  %v2706_v41 = vld [vmem:[#allocation6 + $0x138] sm:$0xff]  }
 0x2ab   : > { %2434 = vmatprep.subr.bf16.mxu1 %v2998_v1 }
 0x2ae   : > { %2435 = vmatpush3.bf16.msra.mxu1 %v2688_v43 }
 0x2af   : > { %2436 = vmatprep.subr.bf16.mxu1 %v2998_v1 }
 0x2b2   : > { %2437 = vmatpush3.bf16.msra.mxu1 %v2690_v45  ;;  %v1175_v45 = vrot.slane %v3490_v42, %v396_v30 }
 0x2b3   : > { %2438 = vmatprep.subr.bf16.mxu1 %v2998_v1 }
 0x2b6   : > { %2439 = vmatpush3.bf16.msra.mxu1 %v2692_v47 }
 0x2b7   : > { %2440 = vmatprep.subr.bf16.mxu1 %v2998_v1 }
 0x2ba   : > { %2441 = vmatpush3.bf16.msra.mxu1 %v2694_v49 }
 0x2bb   : > { %2442 = vmatprep.subr.bf16.mxu1 %v2998_v1 }
 0x2be   : > { %2443 = vmatpush3.bf16.msra.mxu1 %v2696_v51 }
 0x2bf   : > { %2444 = vmatprep.subr.bf16.mxu1 %v2998_v1 }
 0x2c2   : > { %2445 = vmatpush3.bf16.msra.mxu1 %v2698_v53 }
 0x2c3   : > { %2470 = vmatprep.subr.bf16.mxu1 %v2998_v1 }
 0x358   : > { %v866_v63 = vpop.f32.mrb[4].mxu1  ;;  %v971_v0 = vpop.f32.mrb[8].mxu0 }
 0x359   : > { %v2368_v3 = vpop.f32.mrb[5].mxu1  ;;  %v2388_v4 = vpop.f32.mrb[9].mxu0  ;;  %v978_v7 = vrot.slane %v971_v0, 4  ;;  %v867_v12 = vadd.f32 %v866_v63, %v783_v2 }
 0x35a   : > { %v869_v5 = vpop.f32.mrb[6].mxu1  ;;  %v974_v6 = vpop.f32.mrb[10].mxu0 }
 0x35b   : > { %v870_v8 = vadd.f32 %v869_v5, %v783_v2  ;;  %v979_v9 = vrot.slane %v974_v6, 4  ;;  %v2369_v10 = vpop.f32.mrb[7].mxu1  ;;  %v2389_v11 = vpop.f32.mrb[11].mxu0 }
 0x35c   : > { %v1139_v10 = vsub.s32 5, %v3346_v29 }
 0x35d   : > { %v981_v13 = vsel %vm980_vm5, %v978_v7, %v979_v9  ;;  %v982_v14 = vsel %vm980_vm5, %v979_v9, %v978_v7 }
 0x35e   : > { %v985_v15 = vsel %vm983_vm6, %v982_v14, 0.0  ;;  %v988_v18 = vadd.f32 %v981_v13, %v870_v8  ;;  %v1129_v8 = vsub.s32 4, %v3346_v29 }
 0x35f   : > { %v987_v19 = vadd.f32 %v985_v15, %v867_v12  ;;  %v1140_v15 = vrot.slane %v3349_v31, %v1139_v10 }
 0x360   : > { %v1130_v9 = vrot.slane %v3349_v31, %v1129_v8 }
 0x378   : > { %v1088_v20 = vpop.f32.mrb[8].mxu1 }
 0x379   : > { %v2408_v21 = vpop.f32.mrb[9].mxu1  ;;  %v1095_v23 = vrot.slane %v1088_v20, 6 }
 0x37a   : > { %v1091_v22 = vpop.f32.mrb[10].mxu1 }
 0x37b   : > { %v1096_v24 = vrot.slane %v1091_v22, 6  ;;  %v2409_v25 = vpop.f32.mrb[11].mxu1 }
 0x37d   : > { %v1098_v26 = vsel %vm594_vm1, %v1096_v24, %v1095_v23  ;;  %v1097_v27 = vsel %vm594_vm1, %v1095_v23, %v1096_v24  ;;  %v1146_v24 = vstv %s1145_s8 }
 0x37e   : > { %v3430_v28 = vadd.f32 %v1097_v27, %v988_v18  ;;  %v1099_v32 = vsel %vm597_vm2, %v1098_v26, 0.0 }
 0x37f   : > { %v3434_v33 = vadd.f32 %v1099_v32, %v987_v19 }
 0x380   : > { %1105 = vadd.xlane.f32.xlu1 %v3430_v28  ;;  %v1110_v34 = vmul.f32 %v3430_v28, %v3430_v28 }
 0x381   : > { %1103 = vadd.xlane.f32.xlu0 %v3434_v33  ;;  %v1109_v35 = vmul.f32 %v3434_v33, %v3434_v33 }
 0x384   : > { %1113 = vadd.xlane.f32.xlu1 %v1110_v34 }
 0x385   : > { %1111 = vadd.xlane.f32.xlu0 %v1109_v35  ;;  %v2699_v35 = vld [vmem:[#allocation6 + $0x100] sm:$0xff]  }
 0x40d   : > { %v1106_v54 = vpop.xlane.xlu1 %1105 }
 0x40e   : > { %v1108_v55 = vmul.f32 0.03125, %v1106_v54  ;;  %v1104_v56 = vpop.xlane.xlu0 %1103 }
 0x40f   : > { %v1107_v57 = vmul.f32 0.03125, %v1104_v56 }
 0x410   : > { %v1118_v59 = vmul.f32 %v1108_v55, %v1108_v55  ;;  %v1134_v13 = vsub.f32 %v3430_v28, %v1108_v55 }
 0x411   : > { %v1114_v58 = vpop.xlane.xlu1 %1113  ;;  %v1117_v63 = vmul.f32 %v1107_v57, %v1107_v57  ;;  %v1133_v18 = vsub.f32 %v3434_v33, %v1107_v57  ;;  %v2700_v33 = vld [vmem:[#allocation6 + $0x108] sm:$0xff]  }
 0x412   : > { %v1116_v60 = vmul.f32 0.03125, %v1114_v58  ;;  %v1112_v61 = vpop.xlane.xlu0 %1111 }
 0x413   : > { %v1115_v0 = vmul.f32 0.03125, %v1112_v61 }
 0x414   : > { %v1120_v2 = vsub.f32 %v1116_v60, %v1118_v59 }
 0x415   : > { %v1119_v3 = vsub.f32 %v1115_v0, %v1117_v63 }
 0x416   : > { %v1122_v4 = vmax.f32 %v1120_v2, 0.0 }
 0x417   : > { %v1121_v5 = vmax.f32 %v1119_v3, 0.0 }
 0x418   : > { %v1124_v6 = vadd.f32 1e-08, %v1122_v4 }
 0x419   : > { %v1123_v7 = vadd.f32 1e-08, %v1121_v5  ;;  %v2707_v5 = vld [vmem:[#allocation8 + $0x140] sm:$0xff]  }
 0x41a   : > { %2735 = vrsqrt.f32 %v1124_v6  ;;  %v2708_v6 = vld [vmem:[#allocation8 + $0x100] sm:$0xff]  }
 0x41b   : > { %2737 = vrsqrt.f32 %v1123_v7  ;;  %v2709_v7 = vld [vmem:[#allocation8 + $0x148] sm:$0xff]  }
 0x424   : > { %v2736_v11 = vpop.eup %2735 }
 0x425   : > { %v2738_v12 = vpop.eup %2737  ;;  %v1132_v14 = vmul.f32 %v2736_v11, %v1130_v9  ;;  %v2711_v11 = vld [vmem:[#allocation8 + $0x150] sm:$0xff]  }
 0x426   : > { %v1131_v19 = vmul.f32 %v2738_v12, %v1130_v9  ;;  %v2710_v9 = vld [vmem:[#allocation8 + $0x108] sm:$0xff]   ;;  %v2712_v12 = vld [vmem:[#allocation8 + $0x110] sm:$0xff]  }
 0x427   : > { %v1136_v20 = vmul.f32 %v1134_v13, %v1132_v14  ;;  %v2713_v13 = vld [vmem:[#allocation8 + $0x158] sm:$0xff]  }
 0x428   : > { %v1135_v21 = vmul.f32 %v1133_v18, %v1131_v19  ;;  %v2714_v14 = vld [vmem:[#allocation8 + $0x118] sm:$0xff]   ;;  %v2716_v18 = vld [vmem:[#allocation8 + $0x120] sm:$0xff]   ;;  %v2717_v19 = vld [vmem:[#allocation8 + $0x168] sm:$0xff]  }
 0x429   : > { %v1142_v22 = vadd.f32 %v1140_v15, %v1136_v20  ;;  %v2718_v20 = vld [vmem:[#allocation8 + $0x128] sm:$0xff]  }
 0x42a   : > { %v1141_v23 = vadd.f32 %v1140_v15, %v1135_v21  ;;  %v2715_v15 = vld [vmem:[#allocation8 + $0x160] sm:$0xff]   ;;  %v2719_v21 = vld [vmem:[#allocation8 + $0x170] sm:$0xff]  }
 0x42b   : > { %v1144_v25 = vmax.f32 %v1142_v22, 0.0  ;;  %v2720_v22 = vld [vmem:[#allocation8 + $0x130] sm:$0xff]  }
 0x42c   : > { %v1143_v26 = vmax.f32 %v1141_v23, 0.0  ;;  %v2721_v23 = vld [vmem:[#allocation8 + $0x178] sm:$0xff]  }
 0x42d   : > { %v1148_v27 = vmul.f32 %v1146_v24, %v1144_v25 }
 0x42e   : > { %v1147_v32 = vmul.f32 %v1146_v24, %v1143_v26  ;;  %v2722_v24 = vld [vmem:[#allocation8 + $0x138] sm:$0xff]  }
 0x42f   : > { %v3469_v34 = vadd.f32 %v1148_v27, %v3324_v17  ;;  %v2701_v17 = vld [vmem:[#allocation6 + $0x110] sm:$0xff]  }
 0x430   : > { %v3472_v28 = vadd.f32 %v1147_v32, %v3321_v16  ;;  %v2702_v16 = vld [vmem:[#allocation6 + $0x118] sm:$0xff]  }
 0x432   : > { %v1153_v31 = vpack.c.bf16 %v3469_v34, %v3472_v28 }
 0x434   : > { %2427 = vmatmul.mubr.bf16.vlgmr.msra.gmra.mrb[12].mxu0 %v1153_v31  ;;  %2447 = vmatmul.mubr.bf16.vlgmr.msra.gmra.mrb[12].mxu1 %v1153_v31 }
 0x435   : > { %2451 = vmatpush3.bf16.msra.mxu0 %v2699_v35  ;;  %2466 = vmatprep.mubr.msk.bf16.mxu0 %vm2999_vm0, %v2998_v1 }
 0x436   : > { %2452 = vmatprep.subr.bf16.mxu0 %v2998_v1  ;;  %2486 = vmatprep.mubr.msk.bf16.mxu1 %vm2999_vm0, %v2998_v1 }
 0x437   : > { %2471 = vmatpush3.bf16.msra.mxu1 %v2707_v5 }
 0x438   : > { %2472 = vmatprep.subr.bf16.mxu1 %v2998_v1 }
 0x439   : > { %2453 = vmatpush3.bf16.msra.mxu0 %v2700_v33 }
 0x43a   : > { %2454 = vmatprep.subr.bf16.mxu0 %v2998_v1 }
 0x43b   : > { %2473 = vmatpush3.bf16.msra.mxu1 %v2709_v7 }
 0x43c   : > { %2474 = vmatprep.subr.bf16.mxu1 %v2998_v1 }
 0x43d   : > { %2455 = vmatpush3.bf16.msra.mxu0 %v2701_v17 }
 0x43e   : > { %2456 = vmatprep.subr.bf16.mxu0 %v2998_v1 }
 0x43f   : > { %2475 = vmatpush3.bf16.msra.mxu1 %v2711_v11  ;;  %v2723_v11 = vld [vmem:[#allocation12] sm:$0xff]  }
 0x440   : > { %2476 = vmatprep.subr.bf16.mxu1 %v2998_v1 }
 0x441   : > { %2457 = vmatpush3.bf16.msra.mxu0 %v2702_v16 }
 0x442   : > { %2458 = vmatprep.subr.bf16.mxu0 %v2998_v1 }
 0x443   : > { %2477 = vmatpush3.bf16.msra.mxu1 %v2713_v13  ;;  %v2725_v13 = vld [vmem:[#allocation12 + $0x10] sm:$0xff]  }
 0x444   : > { %2478 = vmatprep.subr.bf16.mxu1 %v2998_v1 }
 0x445   : > { %2459 = vmatpush3.bf16.msra.mxu0 %v2703_v36 }
 0x446   : > { %2460 = vmatprep.subr.bf16.mxu0 %v2998_v1 }
 0x447   : > { %2479 = vmatpush3.bf16.msra.mxu1 %v2715_v15  ;;  %v2727_v15 = vld [vmem:[#allocation12 + $0x20] sm:$0xff]  }
 0x448   : > { %2480 = vmatprep.subr.bf16.mxu1 %v2998_v1 }
 0x449   : > { %2461 = vmatpush3.bf16.msra.mxu0 %v2704_v38 }
 0x44a   : > { %2462 = vmatprep.subr.bf16.mxu0 %v2998_v1 }
 0x44b   : > { %2481 = vmatpush3.bf16.msra.mxu1 %v2717_v19  ;;  %v2729_v19 = vld [vmem:[#allocation12 + $0x30] sm:$0xff]  }
 0x44c   : > { %2482 = vmatprep.subr.bf16.mxu1 %v2998_v1 }
 0x44d   : > { %2463 = vmatpush3.bf16.msra.mxu0 %v2705_v40 }
 0x44e   : > { %2464 = vmatprep.subr.bf16.mxu0 %v2998_v1 }
 0x44f   : > { %2483 = vmatpush3.bf16.msra.mxu1 %v2719_v21 }
 0x450   : > { %2484 = vmatprep.subr.bf16.mxu1 %v2998_v1 }
 0x451   : > { %2465 = vmatpush3.bf16.msra.mxu0 %v2706_v41 }
 0x452   : > { %2490 = vmatprep.subr.bf16.mxu0 %v2998_v1 }
 0x453   : > { %2485 = vmatpush3.bf16.msra.mxu1 %v2721_v23 }
 0x454   : > { %2467 = vmatmul.mubr.bf16.vlgmr.msra.gmra.mrb[16].mxu0 %v1153_v31  ;;  %2510 = vmatprep.subr.bf16.mxu1 %v2998_v1 }
 0x455   : > { %2506 = vmatprep.mubr.msk.bf16.mxu0 %vm2999_vm0, %v2998_v1  ;;  %2491 = vmatpush3.bf16.msra.mxu0 %v2708_v6 }
 0x456   : > { %2492 = vmatprep.subr.bf16.mxu0 %v2998_v1 }
 0x459   : > { %2493 = vmatpush3.bf16.msra.mxu0 %v2710_v9 }
 0x45a   : > { %2494 = vmatprep.subr.bf16.mxu0 %v2998_v1 }
 0x45d   : > { %2495 = vmatpush3.bf16.msra.mxu0 %v2712_v12  ;;  %v2724_v12 = vld [vmem:[#allocation12 + $0x8] sm:$0xff]  }
 0x45e   : > { %2496 = vmatprep.subr.bf16.mxu0 %v2998_v1 }
 0x461   : > { %2497 = vmatpush3.bf16.msra.mxu0 %v2714_v14  ;;  %v2726_v14 = vld [vmem:[#allocation12 + $0x18] sm:$0xff]  }
 0x462   : > { %2498 = vmatprep.subr.bf16.mxu0 %v2998_v1 }
 0x465   : > { %2499 = vmatpush3.bf16.msra.mxu0 %v2716_v18  ;;  %v2728_v18 = vld [vmem:[#allocation12 + $0x28] sm:$0xff]  }
 0x466   : > { %2500 = vmatprep.subr.bf16.mxu0 %v2998_v1 }
 0x469   : > { %2501 = vmatpush3.bf16.msra.mxu0 %v2718_v20  ;;  %v2730_v20 = vld [vmem:[#allocation12 + $0x38] sm:$0xff]  }
 0x46a   : > { %2502 = vmatprep.subr.bf16.mxu0 %v2998_v1 }
 0x46d   : > { %2503 = vmatpush3.bf16.msra.mxu0 %v2720_v22 }
 0x46e   : > { %2504 = vmatprep.subr.bf16.mxu0 %v2998_v1 }
 0x471   : > { %2505 = vmatpush3.bf16.msra.mxu0 %v2722_v24 }
 0x507   : > { %v1258_v43 = vpop.f32.mrb[12].mxu0  ;;  %v1363_v44 = vpop.f32.mrb[12].mxu1 }
 0x508   : > { %v2428_v46 = vpop.f32.mrb[13].mxu0  ;;  %v2448_v47 = vpop.f32.mrb[13].mxu1  ;;  %v1259_v60 = vadd.f32 %v1258_v43, %v1175_v45 }
 0x509   : > { %v1261_v48 = vpop.f32.mrb[14].mxu0  ;;  %v1366_v49 = vpop.f32.mrb[14].mxu1  ;;  %v1517_v46 = vrot.slane %v3490_v42, %v746_v37  ;;  %v1554_v37 = vrot.slane %v3490_v42, %v782_v62 }
 0x50a   : > { %v1262_v50 = vadd.f32 %v1261_v48, %v1175_v45  ;;  %v2429_v51 = vpop.f32.mrb[15].mxu0  ;;  %v2449_v52 = vpop.f32.mrb[15].mxu1 }
 0x50b   : > { %v1527_v51 = vrot.slane %v3490_v42, %v756_v39 }
 0x50c   : > { %v1375_v53 = vadd.f32 %v1363_v44, %v1262_v50 }
 0x527   : > { %v1475_v54 = vpop.f32.mrb[16].mxu0 }
 0x528   : > { %v2468_v55 = vpop.f32.mrb[17].mxu0  ;;  %v1482_v57 = vrot.slane %v1475_v54, 4 }
 0x529   : > { %v1478_v56 = vpop.f32.mrb[18].mxu0 }
 0x52a   : > { %v1483_v58 = vrot.slane %v1478_v56, 4  ;;  %v2469_v59 = vpop.f32.mrb[19].mxu0 }
 0x52c   : > { %v1485_v61 = vsel %vm980_vm5, %v1483_v58, %v1482_v57  ;;  %v1484_v30 = vsel %vm980_vm5, %v1482_v57, %v1483_v58 }
 0x52d   : > { %v3499_v63 = vadd.f32 %v1484_v30, %v1375_v53  ;;  %v1486_v0 = vsel %vm983_vm6, %v1485_v61, 0.0 }
 0x52e   : > { %v3503_v2 = vadd.f32 %v1486_v0, %v1259_v60 }
 0x52f   : > { %1492 = vadd.xlane.f32.xlu1 %v3499_v63  ;;  %v1497_v3 = vmul.f32 %v3499_v63, %v3499_v63 }
 0x530   : > { %1490 = vadd.xlane.f32.xlu0 %v3503_v2  ;;  %v1496_v4 = vmul.f32 %v3503_v2, %v3503_v2 }
 0x533   : > { %1500 = vadd.xlane.f32.xlu1 %v1497_v3 }
 0x534   : > { %1498 = vadd.xlane.f32.xlu0 %v1496_v4 }
 0x5bc   : > { %v1493_v25 = vpop.xlane.xlu1 %1492 }
 0x5bd   : > { %v1495_v26 = vmul.f32 0.03125, %v1493_v25  ;;  %v1491_v27 = vpop.xlane.xlu0 %1490 }
 0x5be   : > { %v1494_v32 = vmul.f32 0.03125, %v1491_v27 }
 0x5bf   : > { %v1505_v31 = vmul.f32 %v1495_v26, %v1495_v26  ;;  %v1521_v49 = vsub.f32 %v3499_v63, %v1495_v26 }
 0x5c0   : > { %v1501_v35 = vpop.xlane.xlu1 %1500  ;;  %v1504_v16 = vmul.f32 %v1494_v32, %v1494_v32  ;;  %v1520_v52 = vsub.f32 %v3503_v2, %v1494_v32 }
 0x5c1   : > { %v1503_v33 = vmul.f32 0.03125, %v1501_v35  ;;  %v1499_v17 = vpop.xlane.xlu0 %1498 }
 0x5c2   : > { %v1502_v36 = vmul.f32 0.03125, %v1499_v17 }
 0x5c3   : > { %v1507_v38 = vsub.f32 %v1503_v33, %v1505_v31 }
 0x5c4   : > { %v1506_v40 = vsub.f32 %v1502_v36, %v1504_v16 }
 0x5c5   : > { %v1509_v41 = vmax.f32 %v1507_v38, 0.0 }
 0x5c6   : > { %v1508_v43 = vmax.f32 %v1506_v40, 0.0 }
 0x5c7   : > { %v1511_v44 = vadd.f32 1e-08, %v1509_v41 }
 0x5c8   : > { %v1510_v45 = vadd.f32 1e-08, %v1508_v43 }
 0x5c9   : > { %2739 = vrsqrt.f32 %v1511_v44 }
 0x5ca   : > { %2741 = vrsqrt.f32 %v1510_v45  ;;  %v1791_v45 = vrot.slane %v3490_v42, %v1139_v10  ;;  %v2166_v10 = vld [vmem:[%s3621_s6] ss:$0 sm:$0xff] }
 0x5d3   : > { %v2740_v47 = vpop.eup %2739 }
 0x5d4   : > { %v2742_v48 = vpop.eup %2741  ;;  %v1519_v50 = vmul.f32 %v2740_v47, %v1517_v46 }
 0x5d5   : > { %v1518_v53 = vmul.f32 %v2742_v48, %v1517_v46 }
 0x5d6   : > { %v1523_v54 = vmul.f32 %v1521_v49, %v1519_v50 }
 0x5d7   : > { %v1522_v55 = vmul.f32 %v1520_v52, %v1518_v53  ;;  %v1797_v53 = vstv %s2165_s22 }
 0x5d8   : > { %v1529_v56 = vadd.f32 %v1527_v51, %v1523_v54 }
 0x5d9   : > { %v1528_v57 = vadd.f32 %v1527_v51, %v1522_v55 }
 0x5da   : > { %v1531_v58 = vmax.f32 %v1529_v56, 0.0 }
 0x5db   : > { %v1530_v59 = vmax.f32 %v1528_v57, 0.0 }
 0x5dd   : > { %v1532_v60 = vpack.c.bf16 %v1531_v58, %v1530_v59 }
 0x5df   : > { %2487 = vmatmul.mubr.bf16.vlgmr.msra.gmra.mrb[16].mxu1 %v1532_v60  ;;  %2507 = vmatmul.mubr.bf16.vlgmr.msra.gmra.mrb[20].mxu0 %v1532_v60 }
 0x5e0   : > { %2526 = vmatprep.mubr.msk.bf16.mxu1 %vm2999_vm0, %v2998_v1  ;;  %2511 = vmatpush3.bf16.msra.mxu1 %v2723_v11 }
 0x5e1   : > { %2512 = vmatprep.subr.bf16.mxu1 %v2998_v1 }
 0x5e4   : > { %2513 = vmatpush3.bf16.msra.mxu1 %v2724_v12 }
 0x5e5   : > { %2514 = vmatprep.subr.bf16.mxu1 %v2998_v1 }
 0x5e8   : > { %2515 = vmatpush3.bf16.msra.mxu1 %v2725_v13 }
 0x5e9   : > { %2516 = vmatprep.subr.bf16.mxu1 %v2998_v1 }
 0x5ec   : > { %2517 = vmatpush3.bf16.msra.mxu1 %v2726_v14 }
 0x5ed   : > { %2518 = vmatprep.subr.bf16.mxu1 %v2998_v1 }
 0x5f0   : > { %2519 = vmatpush3.bf16.msra.mxu1 %v2727_v15 }
 0x5f1   : > { %2520 = vmatprep.subr.bf16.mxu1 %v2998_v1 }
 0x5f4   : > { %2521 = vmatpush3.bf16.msra.mxu1 %v2728_v18 }
 0x5f5   : > { %2522 = vmatprep.subr.bf16.mxu1 %v2998_v1 }
 0x5f8   : > { %2523 = vmatpush3.bf16.msra.mxu1 %v2729_v19 }
 0x5f9   : > { %2524 = vmatprep.subr.bf16.mxu1 %v2998_v1  ;;  %v1781_v1 = vrot.slane %v3490_v42, %v1129_v8 }
 0x5fc   : > { %2525 = vmatpush3.bf16.msra.mxu1 %v2730_v20 }
 0x6b2   : > { %v1637_v39 = vpop.f32.mrb[16].mxu1  ;;  %v1743_v61 = vpop.f32.mrb[20].mxu0 }
 0x6b3   : > { %v3539_v30 = vadd.f32 %v1637_v39, %v1554_v37  ;;  %v2488_v63 = vpop.f32.mrb[17].mxu1  ;;  %v2508_v0 = vpop.f32.mrb[21].mxu0 }
 0x6b4   : > { %v1640_v2 = vpop.f32.mrb[18].mxu1  ;;  %v1746_v3 = vpop.f32.mrb[22].mxu0 }
 0x6b5   : > { %v1641_v4 = vadd.f32 %v1640_v2, %v1554_v37  ;;  %1754 = vadd.xlane.f32.xlu0 %v3539_v30  ;;  %v2489_v5 = vpop.f32.mrb[19].mxu1  ;;  %v2509_v6 = vpop.f32.mrb[23].mxu0  ;;  %v1760_v9 = vmul.f32 %v3539_v30, %v3539_v30 }
 0x6b7   : > { %v1753_v7 = vadd.f32 %v1743_v61, %v1641_v4 }
 0x6b9   : > { %1762 = vadd.xlane.f32.xlu0 %v1760_v9  ;;  %1756 = vadd.xlane.f32.xlu1 %v1753_v7  ;;  %v1761_v62 = vmul.f32 %v1753_v7, %v1753_v7 }
 0x6bd   : > { %1764 = vadd.xlane.f32.xlu1 %v1761_v62 }
 0x742   : > { %v1755_v21 = vpop.xlane.xlu0 %1754 }
 0x743   : > { %v1758_v22 = vmul.f32 0.03125, %v1755_v21 }
 0x745   : > { %v1768_v25 = vmul.f32 %v1758_v22, %v1758_v22  ;;  %v1784_v43 = vsub.f32 %v3539_v30, %v1758_v22 }
 0x746   : > { %v1763_v23 = vpop.xlane.xlu0 %1762  ;;  %v1757_v24 = vpop.xlane.xlu1 %1756 }
 0x747   : > { %v1766_v26 = vmul.f32 0.03125, %v1763_v23  ;;  %v1759_v27 = vmul.f32 0.03125, %v1757_v24 }
 0x749   : > { %v1770_v32 = vsub.f32 %v1766_v26, %v1768_v25  ;;  %v1769_v33 = vmul.f32 %v1759_v27, %v1759_v27  ;;  %v1785_v48 = vsub.f32 %v1753_v7, %v1759_v27 }
 0x74a   : > { %v1765_v35 = vpop.xlane.xlu1 %1764 }
 0x74b   : > { %v1772_v31 = vmax.f32 %v1770_v32, 0.0  ;;  %v1767_v17 = vmul.f32 0.03125, %v1765_v35 }
 0x74d   : > { %v1774_v16 = vadd.f32 1e-08, %v1772_v31  ;;  %v1771_v36 = vsub.f32 %v1767_v17, %v1769_v33 }
 0x74f   : > { %2743 = vrsqrt.f32 %v1774_v16  ;;  %v1773_v38 = vmax.f32 %v1771_v36, 0.0 }
 0x751   : > { %v1775_v40 = vadd.f32 1e-08, %v1773_v38 }
 0x753   : > { %2745 = vrsqrt.f32 %v1775_v40 }
 0x759   : > { %v2744_v41 = vpop.eup %2743 }
 0x75a   : > { %v1782_v44 = vmul.f32 %v2744_v41, %v1781_v1 }
 0x75c   : > { %v1786_v46 = vmul.f32 %v1784_v43, %v1782_v44 }
 0x75d   : > { %v2746_v47 = vpop.eup %2745 }
 0x75e   : > { %v1783_v49 = vmul.f32 %v2746_v47, %v1781_v1  ;;  %v1792_v50 = vadd.f32 %v1791_v45, %v1786_v46 }
 0x760   : > { %v1787_v51 = vmul.f32 %v1785_v48, %v1783_v49  ;;  %v1794_v52 = vmax.f32 %v1792_v50, 0.0 }
 0x762   : > { %v1793_v8 = vadd.f32 %v1791_v45, %v1787_v51  ;;  %v1798_v55 = vmul.f32 %v1797_v53, %v1794_v52 }
 0x764   : > { %v1795_v54 = vmax.f32 %v1793_v8, 0.0  ;;  %v1800_v57 = vadd.f32 %v1798_v55, %v3472_v28 }
 0x766   : > { %v1799_v56 = vmul.f32 %v1797_v53, %v1795_v54 }
 0x768   : > { %v1801_v29 = vadd.f32 %v1799_v56, %v3469_v34 }
 0x76a   : > { %v1802_v58 = vpack.c.bf16 %v1801_v29, %v1800_v57 }
 0x76c   : > { %2527 = vmatmul.mubr.bf16.vlgmr.msra.gmra.mrb[20].mxu1 %v1802_v58 }
 0x83f   : > { %v1908_v42 = vpop.f32.mrb[20].mxu1 }
 0x840   : > { %v1909_v59 = vadd.f32 %v2166_v10, %v1908_v42  ;;  %v2528_v28 = vpop.f32.mrb[21].mxu1 }
 0x841   : > { %v1911_v34 = vpop.f32.mrb[22].mxu1 }
 0x842   : > { %1915 = vst [vmem:[%s368_s17] sm:$0xff] %v1909_v59  ;;  %v1912_v60 = vadd.f32 %v2166_v10, %v1911_v34  ;;  %v2529_v37 = vpop.f32.mrb[23].mxu1 }
 0x844   : > { %1916 = vst [vmem:[%s368_s17 + $0x8] sm:$0xff] %v1912_v60 }
 0x845   : > { %2917 = shalt.err (!%p2914_p2)
}
 0x846   : > { %s2918_s8 = scalar_lea.hbm %s3571_s10, 256  ;;  %s2922_s21 = scalar_lea.hbm %s3622_s7, 512 }
 0x847   : > { %p2919_p1 = scmp.ne.s32.totalorder %s3571_s10, %s2918_s8  ;;  %p2923_p13 = scmp.lt.u32.totalorder %s3571_s10, %s3622_s7 }
 0x848   : > { %p2924_p12 = scmp.lt.u32.totalorder %s2922_s21, %s2918_s8  ;;  %p2926_p3 = scmp.lt.u32.totalorder %s2918_s8, %s3571_s10 }
 0x849   : > { %p2920_p7 = pnand %p2919_p1, %p3651_p5 }
 0x84a   : > { %p2925_p0 = por %p2924_p12, %p2923_p13 }
 0x84b   : > { %p2921_p11 = pneg %p2920_p7 }
 0x84c   : > { %p2927_p9 = por %p2926_p3, %p2925_p0 }
 0x84e   : > { %p2928_p4 = pnand %p2927_p9, %p2921_p11 }
 0x850   : > { %2931 = shalt.err (!%p2928_p4)
}
 0x851   : > { %s3001_s12 = smov 128   ;;  %s3002_s29 = smov 8  }
 0x852   : > { %2552 = dma.vmem_to_hbm [thread:$0]  (%p3651_p5), %s3566_s15, 256, %s3571_s10, %s1918_s28, %s3001_s12, %s3001_s12, %s3002_s29  }
 0x853 PF: > { %s1946_s30 = sand.u32 1, %s2974_s24   ;;  %p3652_p10 = scmp.ne.s32.totalorder %s3640_s18, 0 }
 0x854   : > { %p3653_p8 = scmp.ge.s32.totalorder %s2986_s27, 2  ;;  %s1947_s1 = scalar_lea.sflag [#allocation4], %s1946_s30 }
 0x856   : > { %p2575_p6 = pnand %p3653_p8, %p3652_p10 }
 0x858   : > { %2969 = dma.done.wait (!%p2575_p6), %s1947_s1, 256  }
 0x859   : > { %2971 = vsyncadd (!%p2575_p6), %s1947_s1, 4294967040  ;;  %p23_p2 = scmp.ge.s32.totalorder %s3198_s19, 4   ;;  %s3654_s24 = smov %s2978_s25 }
 0x85a   : > { %s3655_s25 = smov %s2982_s26  ;;  %s3656_s26 = smov %s3210_s20 }
 0x85b   : > { %s3657_s27 = smov %s3198_s19  ;;  %25 = sbr.rel (!%p23_p2) target bundleno = 10 (0xa), region = 125 }
 0x862   :  { %1952 = vsyncpa [#allocation3], 1 }
 0x863   :  { %1954 = vsyncpa [#allocation3 + $0x1], 1 }
 0x864   :  { %1955 = vsyncpa [#allocation7], 1 }
 0x865   :  { %1956 = vsyncpa [#allocation10], 1 }
 0x866   :  { %1957 = vsyncpa [#allocation4], 1 }
 0x867   :  { %1959 = vsyncpa [#allocation4 + $0x1], 1 }
 0x868   :  { %1960 = vsyncpa [#allocation5], 1 }
 0x869   :  { %1962 = vsyncpa [#allocation5 + $0x1], 1 }

</bundles_post_ra>
